<compile_context>
chip_gen: v5e
topology: v5e:2x2
jax: 0.10.0
libtpu: 0.0.40
codegen_flags: <defaults>
</compile_context>

<pallas_src>
import functools
import math

import jax
import jax.numpy as jnp
from jax.experimental import pallas as pl
from jax.experimental.pallas import tpu as pltpu

BN_EPS = 1e-5
ACT_DTYPE = jnp.bfloat16          # activation / weight dtype fed to the MXU
MAX_L_TILE = 512                  # flat output rows per grid step (multiple of 16)
S2D_WEIGHT_BYTES_MAX = 8 * 1024 * 1024  # cap on space-to-depth expanded weight size


def _round_up(x, m):
    return (x + m - 1) // m * m


# ----------------------------------------------------------------------------
# Pallas kernels
# ----------------------------------------------------------------------------
def _conv_kernel(x_ref, w_ref, sc_ref, sh_ref, *rest,
                 KH, KW, Wp, LT, relu, sigmoid, input_relu, has_residual):
    """Stride-1 conv over a row-flattened padded image, one flat output tile per step.

    x_ref:  (1, in_rows, Cin)   padded input, spatial dims row-major flattened (+ tail pad)
    w_ref:  (KH, KW, Cin, Cout) bf16 weights
    sc_ref: (1, Cout)           per-channel scale (folded frozen BatchNorm), f32
    sh_ref: (1, Cout)           per-channel shift (BN beta / conv bias), f32
    rest:   optional residual (1, LT, Cout), then output (1, LT, Cout)
    """
    if has_residual:
        r_ref, o_ref = rest
    else:
        (o_ref,) = rest
    cout = o_ref.shape[-1]
    t = pl.program_id(1)
    base = pl.multiple_of(t * LT, LT)

    if input_relu:
        # hoisted: relu the union of all tap windows once (not once per tap)
        win = LT + (KH - 1) * Wp + (KW - 1)
        xwin = jnp.maximum(x_ref[0, pl.ds(base, win), :], 0.0)

    acc = jnp.zeros((LT, cout), jnp.float32)
    for kh in range(KH):
        for kw in range(KW):
            off = kh * Wp + kw
            if input_relu:
                patch = xwin[off:off + LT, :]
            else:
                patch = x_ref[0, pl.ds(base + off, LT), :]
            acc = acc + jnp.dot(patch, w_ref[kh, kw],
                                preferred_element_type=jnp.float32)

    acc = acc * sc_ref[...] + sh_ref[...]
    if has_residual:
        acc = acc + r_ref[0].astype(jnp.float32)
    if relu:
        acc = jnp.maximum(acc, 0.0)
    if sigmoid:
        acc = 1.0 / (1.0 + jnp.exp(-acc))
    o_ref[0] = acc.astype(o_ref.dtype)


def _maxpool_kernel(x_ref, o_ref, *, KH, KW, Wp, LT):
    c = o_ref.shape[-1]
    acc = jnp.full((LT, c), -jnp.inf, jnp.float32)
    for kh in range(KH):
        for kw in range(KW):
            acc = jnp.maximum(acc, x_ref[0, pl.ds(kh * Wp + kw, LT), :]
                              .astype(jnp.float32))
    o_ref[0] = acc.astype(o_ref.dtype)


@functools.lru_cache(maxsize=None)
def _conv_call(N, in_rows, Wp, Cin, Cout, KH, KW, LT, n_tiles,
               relu, sigmoid, input_relu, has_residual):
    kernel = functools.partial(_conv_kernel, KH=KH, KW=KW, Wp=Wp, LT=LT,
                               relu=relu, sigmoid=sigmoid,
                               input_relu=input_relu, has_residual=has_residual)
    in_specs = [
        pl.BlockSpec((1, in_rows, Cin), lambda n, t: (n, 0, 0)),
        pl.BlockSpec((KH, KW, Cin, Cout), lambda n, t: (0, 0, 0, 0)),
        pl.BlockSpec((1, Cout), lambda n, t: (0, 0)),
        pl.BlockSpec((1, Cout), lambda n, t: (0, 0)),
    ]
    if has_residual:
        in_specs.append(pl.BlockSpec((1, LT, Cout), lambda n, t: (n, t, 0)))
    call = pl.pallas_call(
        kernel,
        out_shape=jax.ShapeDtypeStruct((N, n_tiles * LT, Cout), ACT_DTYPE),
        grid=(N, n_tiles),
        in_specs=in_specs,
        out_specs=pl.BlockSpec((1, LT, Cout), lambda n, t: (n, t, 0)),
        compiler_params=pltpu.CompilerParams(
            dimension_semantics=("parallel", "parallel"),
            vmem_limit_bytes=48 * 1024 * 1024),
    )
    return jax.jit(call)


@functools.lru_cache(maxsize=None)
def _maxpool_call(N, in_rows, Wp, C, K, L_pad):
    kernel = functools.partial(_maxpool_kernel, KH=K, KW=K, Wp=Wp, LT=L_pad)
    call = pl.pallas_call(
        kernel,
        out_shape=jax.ShapeDtypeStruct((N, L_pad, C), ACT_DTYPE),
        grid=(N,),
        in_specs=[pl.BlockSpec((1, in_rows, C), lambda n: (n, 0, 0))],
        out_specs=pl.BlockSpec((1, L_pad, C), lambda n: (n, 0, 0)),
        compiler_params=pltpu.CompilerParams(dimension_semantics=("parallel",)),
    )
    return jax.jit(call)


# ----------------------------------------------------------------------------
# Wrappers (padding / flatten / space-to-depth glue around the kernels)
# ----------------------------------------------------------------------------
def _space_to_depth(xp, w, s, A, Ho, Wo):
    """Rewrite a stride-s KxK conv as a stride-1 AxA conv over s^2*Cin channels."""
    N, Hp, Wp, Cin = xp.shape
    KH, KW, _, Cout = w.shape
    Hs = max(-(-Hp // s), Ho + A - 1)
    Ws = max(-(-Wp // s), Wo + A - 1)
    xp = jnp.pad(xp, ((0, 0), (0, Hs * s - Hp), (0, Ws * s - Wp), (0, 0)))
    xs = xp.reshape(N, Hs, s, Ws, s, Cin).transpose(0, 1, 3, 2, 4, 5)
    xs = xs.reshape(N, Hs, Ws, s * s * Cin)
    wp = jnp.pad(w, ((0, A * s - KH), (0, A * s - KW), (0, 0), (0, 0)))
    ws = wp.reshape(A, s, A, s, Cin, Cout).transpose(0, 2, 1, 3, 4, 5)
    ws = ws.reshape(A, A, s * s * Cin, Cout)
    return xs, ws


def conv2d(x, w, scale, shift, *, stride=1, padding=0,
           relu=False, sigmoid=False, input_relu=False, residual=None):
    N = x.shape[0]
    KH, KW, _, Cout = w.shape
    Ho = (x.shape[1] + 2 * padding - KH) // stride + 1
    Wo = (x.shape[2] + 2 * padding - KW) // stride + 1

    # 1x1 strided conv == subsample input first (exact, removes all over-compute)
    if stride > 1 and KH == 1 and KW == 1 and padding == 0:
        x = x[:, ::stride, ::stride, :]
        stride = 1

    xp = jnp.pad(x, ((0, 0), (padding, padding), (padding, padding), (0, 0)))

    if stride > 1:
        A = -(-KH // stride)
        s2d_bytes = A * A * stride * stride * x.shape[3] * Cout * 2
        if s2d_bytes <= S2D_WEIGHT_BYTES_MAX:
            xp, w = _space_to_depth(xp, w, stride, A, Ho, Wo)
            KH, KW = w.shape[0], w.shape[1]
            stride = 1
        # else: compute at stride 1 and subsample (only the tiny FPN p6 map here)

    _, Hp, Wp, Cin = xp.shape
    Ho1, Wo1 = Hp - KH + 1, Wp - KW + 1            # stride-1 output extent
    L = Ho1 * Wp
    LT = min(MAX_L_TILE, _round_up(L, 16))
    L_pad = _round_up(L, LT)
    n_tiles = L_pad // LT
    in_rows = _round_up(L_pad + (KH - 1) * Wp + (KW - 1), 16)

    xflat = xp.astype(ACT_DTYPE).reshape(N, Hp * Wp, Cin)
    xflat = jnp.pad(xflat, ((0, 0), (0, in_rows - Hp * Wp), (0, 0)))

    args = [xflat, w.astype(ACT_DTYPE),
            scale.astype(jnp.float32).reshape(1, Cout),
            shift.astype(jnp.float32).reshape(1, Cout)]
    has_residual = residual is not None
    if has_residual:
        r = residual.astype(ACT_DTYPE)
        if r.shape[2] != Wp:
            r = jnp.pad(r, ((0, 0), (0, 0), (0, Wp - r.shape[2]), (0, 0)))
        r = r.reshape(N, r.shape[1] * Wp, Cout)
        r = jnp.pad(r, ((0, 0), (0, L_pad - r.shape[1]), (0, 0)))
        args.append(r)

    call = _conv_call(N, in_rows, Wp, Cin, Cout, KH, KW, LT, n_tiles,
                      relu, sigmoid, input_relu, has_residual)
    y = call(*args)
    y = y[:, :Ho1 * Wp, :].reshape(N, Ho1, Wp, Cout)   # drop flat tail padding
    if stride > 1:                                     # fallback path only
        y = y[:, ::stride, ::stride, :]
    return y[:, :Ho, :Wo, :]                           # drop wrap-around columns / extra rows


def maxpool2d(x, *, ksize=3, stride=2, padding=1):
    N, H, W, C = x.shape
    Hp, Wp = H + 2 * padding, W + 2 * padding
    Ho1, Wo1 = Hp - ksize + 1, Wp - ksize + 1
    Ho = (Hp - ksize) // stride + 1
    Wo = (Wp - ksize) // stride + 1
    L = Ho1 * Wp
    L_pad = _round_up(L, 16)
    in_rows = _round_up(L_pad + (ksize - 1) * Wp + (ksize - 1), 16)
    xp = jnp.pad(x.astype(ACT_DTYPE),
                 ((0, 0), (padding, padding), (padding, padding), (0, 0)),
                 constant_values=-jnp.inf)
    xflat = xp.reshape(N, Hp * Wp, C)
    xflat = jnp.pad(xflat, ((0, 0), (0, in_rows - Hp * Wp), (0, 0)),
                    constant_values=-jnp.inf)
    y = _maxpool_call(N, in_rows, Wp, C, ksize, L_pad)(xflat)
    y = y[:, :L, :].reshape(N, Ho1, Wp, C)[:, :, :Wo1, :]
    return y[:, ::stride, ::stride, :][:, :Ho, :Wo, :]


def upsample2_nearest(x):
    # nn.Upsample(scale_factor=2, mode='nearest'); the subsequent "+ lateral conv" is
    # fused into the conv kernel as a residual.
    return jnp.repeat(jnp.repeat(x, 2, axis=1), 2, axis=2)


def conv1_stem(x, w, scale, shift):
    """7x7 / stride 2 / pad 3 stem as im2col + 1x1 conv (K = 147, stride folded away)."""
    N, H, W, Cin = x.shape
    KH, KW, _, Cout = w.shape
    stride, padding = 2, 3
    Ho = (H + 2 * padding - KH) // stride + 1
    Wo = (W + 2 * padding - KW) // stride + 1
    xp = jnp.pad(x, ((0, 0), (padding, padding), (padding, padding), (0, 0)))
    cols = []
    for kh in range(KH):
        for kw in range(KW):
            cols.append(xp[:, kh:kh + stride * (Ho - 1) + 1:stride,
                           kw:kw + stride * (Wo - 1) + 1:stride, :])
    patches = jnp.concatenate(cols, axis=-1)               # (N, Ho, Wo, KH*KW*Cin)
    wmat = w.reshape(1, 1, KH * KW * Cin, Cout)
    return conv2d(patches, wmat, scale, shift, relu=True)


# ----------------------------------------------------------------------------
# Parameters (deterministic, mirrors ResNet.__init__ with Bottleneck blocks)
# ----------------------------------------------------------------------------
class _KeyGen:
    def __init__(self, seed):
        self._key = jax.random.PRNGKey(seed)

    def __call__(self):
        self._key, sub = jax.random.split(self._key)
        return sub


def _conv_weight(kg, kh, kw, cin, cout):
    n = kh * kw * cout                       # matches m.weight.data.normal_(0, sqrt(2/n))
    return math.sqrt(2.0 / n) * jax.random.normal(kg(), (kh, kw, cin, cout), jnp.float32)


def _conv_bias(kg, kh, kw, cin, cout):
    bound = 1.0 / math.sqrt(kh * kw * cin)   # PyTorch Conv2d default bias init range
    return jax.random.uniform(kg(), (cout,), jnp.float32, -bound, bound)


def _bn_scale_shift(c):
    # Frozen BatchNorm (eval mode), default buffers: gamma=1, beta=0, mean=0, var=1.
    gamma = jnp.ones((c,), jnp.float32)
    beta = jnp.zeros((c,), jnp.float32)
    mean = jnp.zeros((c,), jnp.float32)
    var = jnp.ones((c,), jnp.float32)
    scale = gamma / jnp.sqrt(var + BN_EPS)
    shift = beta - mean * scale
    return scale, shift


def _make_bottleneck(kg, inplanes, planes, stride):
    bp = {
        'stride': stride,
        'w1': _conv_weight(kg, 1, 1, inplanes, planes),          # conv1 1x1 (+bn1, relu)
        'w2': _conv_weight(kg, 3, 3, planes, planes),            # conv2 3x3 stride (+bn2, relu)
        'w3': _conv_weight(kg, 1, 1, planes, planes * 4),        # conv3 1x1 (+bn3)
    }
    if stride != 1 or inplanes != planes * 4:
        bp['wd'] = _conv_weight(kg, 1, 1, inplanes, planes * 4)  # downsample 1x1 (+bn)
    return bp


def init_params(n_classes=2, layers=(1, 1, 1, 1), n_anchors=9, seed=0):
    kg = _KeyGen(seed)
    params = {'conv1_w': _conv_weight(kg, 7, 7, 3, 64)}
    inplanes = 64

    def make_layer(planes, blocks, stride):
        nonlocal inplanes
        blks = [_make_bottleneck(kg, inplanes, planes, stride)]
        inplanes = planes * 4
        for _ in range(1, blocks):
            blks.append(_make_bottleneck(kg, inplanes, planes, 1))
        return blks

    params['layer1'] = make_layer(64, layers[0], 1)
    params['layer2'] = make_layer(128, layers[1], 2)
    params['layer3'] = make_layer(256, layers[2], 2)
    params['layer4'] = make_layer(512, layers[3], 2)

    fpn_ch = 256
    c3_d, c4_d, c5_d = 512, 1024, 2048       # Bottleneck expansion=4 channel depths
    fpn = {}
    for name, (kh, kw, cin) in {
        'p6': (3, 3, c5_d), 'p7': (3, 3, fpn_ch),
        'c5': (1, 1, c5_d), 'p5': (3, 3, fpn_ch),
        'c4': (1, 1, c4_d), 'p4': (3, 3, fpn_ch),
        'c3': (1, 1, c3_d), 'p3': (3, 3, fpn_ch),
    }.items():
        fpn[name + '_w'] = _conv_weight(kg, kh, kw, cin, fpn_ch)
        fpn[name + '_b'] = _conv_bias(kg, kh, kw, cin, fpn_ch)
    params['fpn'] = fpn

    reg = {}
    for i in range(4):
        reg['w%d' % i] = _conv_weight(kg, 3, 3, fpn_ch, fpn_ch)
        reg['b%d' % i] = _conv_bias(kg, 3, 3, fpn_ch, fpn_ch)
    reg['box_w'] = jnp.zeros((3, 3, fpn_ch, n_anchors * 4), jnp.float32)
    reg['box_b'] = jnp.zeros((n_anchors * 4,), jnp.float32)
    params['reg'] = reg

    cls = {}
    for i in range(4):
        cls['w%d' % i] = _conv_weight(kg, 3, 3, fpn_ch, fpn_ch)
        cls['b%d' % i] = _conv_bias(kg, 3, 3, fpn_ch, fpn_ch)
    prior = 0.01
    cls['cls_w'] = jnp.zeros((3, 3, fpn_ch, n_anchors * n_classes), jnp.float32)
    cls['cls_b'] = jnp.full((n_anchors * n_classes,),
                            -math.log((1.0 - prior) / prior), jnp.float32)
    params['cls'] = cls
    return params


# ----------------------------------------------------------------------------
# Forward pass (mirrors ResNet.forward / FPN / Reg+Cls subnets)
# ----------------------------------------------------------------------------
def _bottleneck_forward(x, bp):
    stride = bp['stride']
    planes = bp['w1'].shape[-1]
    out_ch = bp['w3'].shape[-1]
    sc, sh = _bn_scale_shift(planes)
    out = conv2d(x, bp['w1'], sc, sh, relu=True)
    out = conv2d(out, bp['w2'], sc, sh, stride=stride, padding=1, relu=True)
    sc3, sh3 = _bn_scale_shift(out_ch)
    if 'wd' in bp:
        identity = conv2d(x, bp['wd'], sc3, sh3, stride=stride)
    else:
        identity = x
    # conv3 + bn3 + residual add + relu fused in one kernel
    return conv2d(out, bp['w3'], sc3, sh3, residual=identity, relu=True)


def _bias_conv(x, w, b, **kw):
    return conv2d(x, w, jnp.ones((w.shape[-1],), jnp.float32), b, **kw)


def _fpn_forward(c3, c4, c5, fp):
    def bias_conv(x, name, **kw):
        return _bias_conv(x, fp[name + '_w'], fp[name + '_b'], **kw)

    p6 = bias_conv(c5, 'p6', stride=2, padding=1)
    p7 = bias_conv(p6, 'p7', stride=2, padding=1, input_relu=True)   # relu(p6) fused
    m5 = bias_conv(c5, 'c5')
    p5 = bias_conv(m5, 'p5', padding=1)
    m4 = bias_conv(c4, 'c4', residual=upsample2_nearest(m5))         # upsample+add fused
    p4 = bias_conv(m4, 'p4', padding=1)
    m3 = bias_conv(c3, 'c3', residual=upsample2_nearest(m4))
    p3 = bias_conv(m3, 'p3', padding=1)
    return [p3, p4, p5, p6, p7]


def _head_final_conv(x, w, b, sigmoid):
    # Pad the tiny head output channels up to 128 lanes (lane-dense stores), slice after.
    c_real = w.shape[-1]
    c_pad = _round_up(c_real, 128)
    wpd = jnp.pad(w, ((0, 0), (0, 0), (0, 0), (0, c_pad - c_real)))
    bpd = jnp.pad(b, ((0, c_pad - c_real),))
    out = _bias_conv(x, wpd, bpd, padding=1, sigmoid=sigmoid)
    return out[..., :c_real]


def _reg_forward(x, rp, n_anchors=9):
    for i in range(4):
        x = _bias_conv(x, rp['w%d' % i], rp['b%d' % i], padding=1, relu=True)
    out = _head_final_conv(x, rp['box_w'], rp['box_b'], sigmoid=False)
    N, H, W, _ = out.shape
    # NHWC already matches permute(0,2,3,1); (h, w, anchor, 4) flattening is contiguous.
    return out.reshape(N, H * W * n_anchors, 4)


def _cls_forward(x, cp, n_anchors=9):
    for i in range(4):
        x = _bias_conv(x, cp['w%d' % i], cp['b%d' % i], padding=1, relu=True)
    n_classes = cp['cls_w'].shape[-1] // n_anchors
    out = _head_final_conv(x, cp['cls_w'], cp['cls_b'], sigmoid=True)
    N, H, W, _ = out.shape
    return out.reshape(N, H * W * n_anchors, n_classes)


def resnet_forward(images_nchw, params):
    # images: (N, 3, H, W) PyTorch NCHW -> NHWC once.
    x = jnp.transpose(images_nchw.astype(jnp.float32), (0, 2, 3, 1))
    sc, sh = _bn_scale_shift(64)
    x = conv1_stem(x, params['conv1_w'], sc, sh)
    x = maxpool2d(x, ksize=3, stride=2, padding=1)
    for bp in params['layer1']:
        x = _bottleneck_forward(x, bp)
    c2 = x
    x = c2
    for bp in params['layer2']:
        x = _bottleneck_forward(x, bp)
    c3 = x
    for bp in params['layer3']:
        x = _bottleneck_forward(x, bp)
    c4 = x
    for bp in params['layer4']:
        x = _bottleneck_forward(x, bp)
    c5 = x
    fmaps = _fpn_forward(c3, c4, c5, params['fpn'])
    box_preds = jnp.concatenate([_reg_forward(f, params['reg']) for f in fmaps], axis=1)
    cls_preds = jnp.concatenate([_cls_forward(f, params['cls']) for f in fmaps], axis=1)
    return box_preds.astype(jnp.float32), cls_preds.astype(jnp.float32)


# ----------------------------------------------------------------------------
if __name__ == "__main__":
    n_classes = 2
    params = init_params(n_classes=n_classes, layers=(1, 1, 1, 1), seed=0)
    images = jax.random.normal(jax.random.PRNGKey(0), (2, 3, 64, 64), jnp.float32)

    box_preds, cls_preds = resnet_forward(images, params)
    jax.block_until_ready((box_preds, cls_preds))

    # pyramid levels: p3 8x8, p4 4x4, p5 2x2, p6 1x1, p7 1x1 ; 9 anchors each
    n_locs = (8 * 8 + 4 * 4 + 2 * 2 + 1 + 1) * 9
    assert box_preds.shape == (2, n_locs, 4), box_preds.shape
    assert cls_preds.shape == (2, n_locs, n_classes), cls_preds.shape
    assert bool(jnp.all(jnp.isfinite(box_preds)))
    assert bool(jnp.all(jnp.isfinite(cls_preds)))
    print("KERNEL_OK")
</pallas_src>

<mosaic_0001>
module attributes {stable_mosaic.version = 11 : i64} {
  func.func @_conv_kernel(%arg0: i32, %arg1: i32, %arg2: memref<1x1024x147xbf16, #tpu.memory_space<vmem>>, %arg3: memref<1x1x147x64xbf16, #tpu.memory_space<vmem>>, %arg4: memref<1x64xf32, #tpu.memory_space<vmem>>, %arg5: memref<1x64xf32, #tpu.memory_space<vmem>>, %arg6: memref<1x512x64xbf16, #tpu.memory_space<vmem>>) attributes {dimension_semantics = [#tpu.dimension_semantics<parallel>, #tpu.dimension_semantics<parallel>], iteration_bounds = array<i64: 2, 2>, scalar_prefetch = 0 : i64, scratch_operands = 0 : i64, tpu.core_type = #tpu.core_type<tc>, window_params = [{transform_indices = @transform_0, window_bounds = array<i64: 1, 1024, 147>}, {pipeline_mode = #tpu.pipeline_mode<synchronous>, transform_indices = @transform_1, window_bounds = array<i64: 1, 1, 147, 64>}, {pipeline_mode = #tpu.pipeline_mode<synchronous>, transform_indices = @transform_2, window_bounds = array<i64: 1, 64>}, {pipeline_mode = #tpu.pipeline_mode<synchronous>, transform_indices = @transform_3, window_bounds = array<i64: 1, 64>}, {transform_indices = @transform_4, window_bounds = array<i64: 1, 512, 64>}]} {
    %c512_i32 = arith.constant 512 : i32
    %0 = arith.muli %arg1, %c512_i32 : i32
    %1 = tpu.assume_multiple %0, 512 : i32
    %cst = arith.constant 0.000000e+00 : f32
    %2 = vector.broadcast %cst : f32 to vector<512x64xf32>
    %c0_i32 = arith.constant 0 : i32
    %3 = arith.addi %1, %c0_i32 : i32
    %c0 = arith.constant 0 : index
    %4 = arith.index_cast %3 : i32 to index
    %c0_0 = arith.constant 0 : index
    %5 = vector.load %arg2[%c0, %4, %c0_0] : memref<1x1024x147xbf16, #tpu.memory_space<vmem>>, vector<1x512x147xbf16>
    %6 = vector.shape_cast %5 : vector<1x512x147xbf16> to vector<512x147xbf16>
    %c0_1 = arith.constant 0 : index
    %c0_2 = arith.constant 0 : index
    %c0_3 = arith.constant 0 : index
    %c0_4 = arith.constant 0 : index
    %7 = vector.load %arg3[%c0_1, %c0_2, %c0_3, %c0_4] : memref<1x1x147x64xbf16, #tpu.memory_space<vmem>>, vector<1x1x147x64xbf16>
    %8 = vector.shape_cast %7 : vector<1x1x147x64xbf16> to vector<147x64xbf16>
    %cst_5 = arith.constant dense<0.000000e+00> : vector<512x64xf32>
    %9 = tpu.matmul %6, %8, %cst_5 {dimension_numbers = #tpu.dot_dimension_numbers<[1], [0], [0], [1], [0, 0, 1, 1], [], []>} : vector<512x147xbf16>, vector<147x64xbf16>, vector<512x64xf32> -> vector<512x64xf32>
    %10 = arith.addf %2, %9 : vector<512x64xf32>
    %c0_6 = arith.constant 0 : index
    %c0_7 = arith.constant 0 : index
    %11 = vector.load %arg4[%c0_6, %c0_7] : memref<1x64xf32, #tpu.memory_space<vmem>>, vector<1x64xf32>
    %12 = vector.broadcast %11 : vector<1x64xf32> to vector<512x64xf32>
    %13 = arith.mulf %10, %12 : vector<512x64xf32>
    %c0_8 = arith.constant 0 : index
    %c0_9 = arith.constant 0 : index
    %14 = vector.load %arg5[%c0_8, %c0_9] : memref<1x64xf32, #tpu.memory_space<vmem>>, vector<1x64xf32>
    %15 = vector.broadcast %14 : vector<1x64xf32> to vector<512x64xf32>
    %16 = arith.addf %13, %15 : vector<512x64xf32>
    %cst_10 = arith.constant 0.000000e+00 : f32
    %17 = vector.broadcast %cst_10 : f32 to vector<512x64xf32>
    %18 = arith.maximumf %16, %17 : vector<512x64xf32>
    %19 = arith.truncf %18 : vector<512x64xf32> to vector<512x64xbf16>
    %c0_11 = arith.constant 0 : index
    %c0_12 = arith.constant 0 : index
    %c0_13 = arith.constant 0 : index
    %20 = vector.load %arg6[%c0_11, %c0_12, %c0_13] : memref<1x512x64xbf16, #tpu.memory_space<vmem>>, vector<1x512x64xbf16>
    %21 = vector.shape_cast %20 : vector<1x512x64xbf16> to vector<512x64xbf16>
    %22 = vector.shape_cast %19 : vector<512x64xbf16> to vector<1x512x64xbf16>
    tpu.vector_store %arg6[%c0_11, %c0_12, %c0_13], %22 {strides = array<i32>} : memref<1x512x64xbf16, #tpu.memory_space<vmem>>, vector<1x512x64xbf16>,
    return
  }
  func.func @transform_0(%arg0: i32, %arg1: i32) -> (i32, i32, i32) {
    %c0_i32 = arith.constant 0 : i32
    %c0_i32_0 = arith.constant 0 : i32
    %c0_i32_1 = arith.constant 0 : i32
    return %arg0, %c0_i32, %c0_i32_0 : i32, i32, i32
  }
  func.func @transform_1(%arg0: i32, %arg1: i32) -> (i32, i32, i32, i32) {
    %c0_i32 = arith.constant 0 : i32
    %c0_i32_0 = arith.constant 0 : i32
    %c0_i32_1 = arith.constant 0 : i32
    %c0_i32_2 = arith.constant 0 : i32
    %c0_i32_3 = arith.constant 0 : i32
    return %c0_i32, %c0_i32_0, %c0_i32_1, %c0_i32_2 : i32, i32, i32, i32
  }
  func.func @transform_2(%arg0: i32, %arg1: i32) -> (i32, i32) {
    %c0_i32 = arith.constant 0 : i32
    %c0_i32_0 = arith.constant 0 : i32
    %c0_i32_1 = arith.constant 0 : i32
    return %c0_i32, %c0_i32_0 : i32, i32
  }
  func.func @transform_3(%arg0: i32, %arg1: i32) -> (i32, i32) {
    %c0_i32 = arith.constant 0 : i32
    %c0_i32_0 = arith.constant 0 : i32
    %c0_i32_1 = arith.constant 0 : i32
    return %c0_i32, %c0_i32_0 : i32, i32
  }
  func.func @transform_4(%arg0: i32, %arg1: i32) -> (i32, i32, i32) {
    %c0_i32 = arith.constant 0 : i32
    %c0_i32_0 = arith.constant 0 : i32
    return %arg0, %arg1, %c0_i32 : i32, i32, i32
  }
}

</mosaic_0001>

<bundles_post_ra>
// kernel: tpu_custom_call.1
= control target key start
LH: loop header
LB: loop body
LE: loop exit
PB: predicated region body
PF: predicated region fallthrough
CT: control target
= control target key end

     0   :  { %s2048_s15 = smov 0   ;;  %s2050_s16 = smov 0   ;;  %s2628_s0 = inlined_call_operand.vmem [shape: bf16[2,1024,147], index: 0, kind: input, shape index: {}]   ;;  %s2629_s1 = inlined_call_operand.vmem [shape: bf16[1,1,147,64], index: 1, kind: input, shape index: {}]   ;;  %s2630_s2 = inlined_call_operand.vmem [shape: f32[1,64], index: 2, kind: input, shape index: {}]   ;;  %s2631_s3 = inlined_call_operand.vmem [shape: f32[1,64], index: 3, kind: input, shape index: {}]   ;;  %s2632_s4 = inlined_call_operand.vmem [shape: bf16[2,1024,64], index: 4, kind: output, shape index: {}]  }
   0x1   :  { %s2052_s17 = smov 0   ;;  %s2054_s18 = smov 0  }
   0x2   :  { %s2056_s19 = smov 0  }
   0x3 LB: > { %s23_s20 = sadd.s32 1, %s2012_s17  ;;  %s26_s21 = sadd.s32 1, %s2016_s18  ;;  %s2020_s19 = sphi %s2056_s19, %s14_s19   ;;  %s2016_s18 = sphi %s2054_s18, %s2636_s18   ;;  %s2012_s17 = sphi %s2052_s17, %s2635_s17   ;;  %s2008_s16 = sphi %s2050_s16, %s2634_s16   ;;  %s2004_s15 = sphi %s2048_s15, %s2633_s15  }
   0x4   : > { %p24_p0 = scmp.ge.s32.totalorder %s23_s20, 2  ;;  %p1517_p1 = scmp.ge.s32.totalorder %s2020_s19, 1 }
   0x5   : > { %p176_p2 = scmp.lt.s32.totalorder %s2020_s19, 5 }
   0x6   : > { %s2638_s20 = smov (%p24_p0, %s23_s20), 0  ;;  %s2640_s21 = smov (!%p24_p0, %s26_s21), %s2016_s18 }
   0x7   : > { %p177_p3 = pnand %p1517_p1, %p176_p2  ;;  %p28_p4 = scmp.ge.s32.totalorder %s2640_s21, 2 }
   0x8   : > { %p206_p5 = scmp.lt.s32.totalorder (!%p177_p3), %s2008_s16, 1  ;;  %s1523_s28 = sshll.u32 (!%p177_p3), %s2004_s15, 9 }
   0x9   : > { %s2642_s21 = smov (%p28_p4, %s2640_s21), 0  ;;  %180 = sbr.rel (%p177_p3) target bundleno = 437 (0x1b5), region = 36 }
   0xe   : > { %v1925_v0 = vld [vmem:[%s2629_s1 + $0x38] sm:$0xff]  ;;  %v310_v1 = vld [vmem:[%s2629_s1 + $0x48] sm:$0x3]  ;;  %vm753_vm0 = vcmask 1040384   ;;  %vm754_vm1 = vcmask 1041408   ;;  %v1924_v3 = vld [vmem:[%s2629_s1 + $0x30] sm:$0xff] }
   0xf   : > { %v636_v2 = vunpack.c.l.b16 %v310_v1  ;;  %760 = vmatpush.bf16.msra.mxu0 %v1925_v0  ;;  %1927 = vmatpush.bf16.msra.mxu2 %v1925_v0  ;;  %v2022_v4 = vmov 65535   ;;  %s2644_s16 = smov (!%p206_p5, %s2008_s16), 1  ;;  %v1923_v9 = vld [vmem:[%s2629_s1 + $0x28] sm:$0xff]  ;;  %v1926_v10 = vld [vmem:[%s2629_s1 + $0x40] sm:$0xff]  ;;  %vm656_vm2 = vcmask 154624   ;;  %v1921_v18 = vld [vmem:[%s2629_s1 + $0x18] sm:$0xff] }
  0x10   : > { %v755_v5 = vsel %vm753_vm0, 4294967295, %v2022_v4  ;;  %s1852_s29 = sshll.u32 %s2644_s16, 10  ;;  %v1922_v14 = vld [vmem:[%s2629_s1 + $0x20] sm:$0xff]  ;;  %v1920_v19 = vld [vmem:[%s2629_s1 + $0x10] sm:$0xff]  ;;  %v1919_v20 = vld [vmem:[%s2629_s1 + $0x8] sm:$0xff]  ;;  %s1521_s30 = sshll.u32 %s2644_s16, 7 }
  0x11   : > { %v646_v6 = vpack.c.b16 %v636_v2, %v636_v2  ;;  %v756_v7 = vsel %vm754_vm1, %v755_v5, 0  ;;  %s210_s8 = scalar_lea.vmem %s2628_s0, %s1852_s29  ;;  %v1918_v26 = vld [vmem:[%s2629_s1] sm:$0xff]  ;;  %s1520_s29 = sshll.u32 %s2004_s15, 6  ;;  %vm1362_vm3 = vcmask 519168  }
  0x12   : > { %s2102_s11 = scalar_lea.vmem %s210_s8, %s1523_s28  ;;  %p214_p6 = scmp.lt.s32.totalorder %s1520_s29, 127 }
  0x13   : > { %v758_v8 = vand.u32 %v756_v7, %v646_v6  ;;  %761 = vmatpush.bf16.msra.mxu0 %v1924_v3  ;;  %1928 = vmatpush.bf16.msra.mxu2 %v1924_v3  ;;  %v1854_v11 = vld [vmem:[%s2102_s11 + $0x4] sm:$0xf]  ;;  %v1530_v12 = vld [vmem:[%s2102_s11 + $0x8] sm:$0xf0]  ;;  %v1888_v15 = vld [vmem:[%s2102_s11 + $0x114] sm:$0xf] }
  0x14   : > { %v1533_v13 = vor.u32 %v1854_v11, %v1530_v12  ;;  %v1666_v16 = vld [vmem:[%s2102_s11 + $0x118] sm:$0xf0]  ;;  %v1856_v21 = vld [vmem:[%s2102_s11 + $0x14] sm:$0xf]  ;;  %v1890_v23 = vld [vmem:[%s2102_s11 + $0x124] sm:$0xf] }
  0x15   : > { %935 = vmatpush.bf16.msra.mxu1 %v758_v8  ;;  %1935 = vmatpush.bf16.msra.mxu3 %v758_v8  ;;  %v1669_v17 = vor.u32 %v1888_v15, %v1666_v16  ;;  %v1538_v22 = vld [vmem:[%s2102_s11 + $0x18] sm:$0xf0]  ;;  %v1674_v24 = vld [vmem:[%s2102_s11 + $0x128] sm:$0xf0]  ;;  %v1528_v27 = vld [vmem:[%s2102_s11] sm:$0xf] }
  0x16   : > { %v1541_v25 = vor.u32 %v1856_v21, %v1538_v22  ;;  %v1855_v28 = vld [vmem:[%s2102_s11 + $0x4] sm:$0xf0]  ;;  %v1656_v29 = vld [vmem:[%s2102_s11 + $0x100] sm:$0xf]  ;;  %v1677_v31 = vor.u32 %v1890_v23, %v1674_v24  ;;  %v1858_v34 = vld [vmem:[%s2102_s11 + $0x24] sm:$0xf] }
  0x17   : > { %762 = vmatpush.bf16.msra.mxu0 %v1923_v9  ;;  %1929 = vmatpush.bf16.msra.mxu2 %v1923_v9  ;;  %v1887_v30 = vld [vmem:[%s2102_s11 + $0x104] sm:$0xf0]  ;;  %v1529_v32 = vor.u32 %v1855_v28, %v1528_v27  ;;  %v1546_v35 = vld [vmem:[%s2102_s11 + $0x28] sm:$0xf0]  ;;  %v1892_v36 = vld [vmem:[%s2102_s11 + $0x134] sm:$0xf] }
  0x18   : > { %v1657_v33 = vor.u32 %v1887_v30, %v1656_v29  ;;  %v1682_v37 = vld [vmem:[%s2102_s11 + $0x138] sm:$0xf0]  ;;  %v1549_v38 = vor.u32 %v1858_v34, %v1546_v35  ;;  %v1536_v39 = vld [vmem:[%s2102_s11 + $0x10] sm:$0xf]  ;;  %v1857_v40 = vld [vmem:[%s2102_s11 + $0x14] sm:$0xf0] }
  0x19   : > { %936 = vmatpush.bf16.msra.mxu1 %v1926_v10  ;;  %1936 = vmatpush.bf16.msra.mxu3 %v1926_v10  ;;  %v1664_v41 = vld [vmem:[%s2102_s11 + $0x110] sm:$0xf]  ;;  %v1889_v42 = vld [vmem:[%s2102_s11 + $0x114] sm:$0xf0]  ;;  %v1685_v43 = vor.u32 %v1892_v36, %v1682_v37  ;;  %v1537_v44 = vor.u32 %v1857_v40, %v1536_v39  ;;  %v1860_v46 = vld [vmem:[%s2102_s11 + $0x34] sm:$0xf] }
  0x1a   : > { %v1665_v45 = vor.u32 %v1889_v42, %v1664_v41  ;;  %v1554_v47 = vld [vmem:[%s2102_s11 + $0x38] sm:$0xf0]  ;;  %v1894_v48 = vld [vmem:[%s2102_s11 + $0x144] sm:$0xf]  ;;  %v1690_v49 = vld [vmem:[%s2102_s11 + $0x148] sm:$0xf0] }
  0x1b   : > { %763 = vmatpush.bf16.msra.mxu0 %v1922_v14  ;;  %1930 = vmatpush.bf16.msra.mxu2 %v1922_v14  ;;  %v1557_v50 = vor.u32 %v1860_v46, %v1554_v47  ;;  %v1544_v51 = vld [vmem:[%s2102_s11 + $0x20] sm:$0xf]  ;;  %v1859_v52 = vld [vmem:[%s2102_s11 + $0x24] sm:$0xf0]  ;;  %v1693_v55 = vor.u32 %v1894_v48, %v1690_v49  ;;  %v1862_v58 = vld [vmem:[%s2102_s11 + $0x44] sm:$0xf] }
  0x1c   : > { %1818 = vmatmul.msk.bf16.vlgmr.msra.gmra.mxu1 %vm656_vm2, %v1533_v13  ;;  %1835 = vmatmul.msk.bf16.vlgmr.msra.gmra.mxu3 %vm656_vm2, %v1669_v17  ;;  %v1672_v53 = vld [vmem:[%s2102_s11 + $0x120] sm:$0xf]  ;;  %v1891_v54 = vld [vmem:[%s2102_s11 + $0x124] sm:$0xf0]  ;;  %v1545_v56 = vor.u32 %v1859_v52, %v1544_v51  ;;  %v1562_v59 = vld [vmem:[%s2102_s11 + $0x48] sm:$0xf0] }
  0x1d   : > { %v1673_v57 = vor.u32 %v1891_v54, %v1672_v53  ;;  %v1896_v60 = vld [vmem:[%s2102_s11 + $0x154] sm:$0xf]  ;;  %v1698_v61 = vld [vmem:[%s2102_s11 + $0x158] sm:$0xf0]  ;;  %v1565_v62 = vor.u32 %v1862_v58, %v1562_v59  ;;  %v1552_v63 = vld [vmem:[%s2102_s11 + $0x30] sm:$0xf] }
  0x1e   : > { %v1861_v0 = vld [vmem:[%s2102_s11 + $0x34] sm:$0xf0]  ;;  %v1680_v1 = vld [vmem:[%s2102_s11 + $0x130] sm:$0xf]  ;;  %v1701_v3 = vor.u32 %v1896_v60, %v1698_v61  ;;  %v1864_v6 = vld [vmem:[%s2102_s11 + $0x54] sm:$0xf] }
  0x1f   : > { %764 = vmatpush.bf16.msra.mxu0 %v1921_v18  ;;  %1931 = vmatpush.bf16.msra.mxu2 %v1921_v18  ;;  %v1893_v2 = vld [vmem:[%s2102_s11 + $0x134] sm:$0xf0]  ;;  %v1553_v4 = vor.u32 %v1861_v0, %v1552_v63  ;;  %v1570_v7 = vld [vmem:[%s2102_s11 + $0x58] sm:$0xf0]  ;;  %v1898_v8 = vld [vmem:[%s2102_s11 + $0x164] sm:$0xf] }
  0x20   : > { %v1681_v5 = vor.u32 %v1893_v2, %v1680_v1  ;;  %v1706_v9 = vld [vmem:[%s2102_s11 + $0x168] sm:$0xf0]  ;;  %v1573_v10 = vor.u32 %v1864_v6, %v1570_v7  ;;  %v1560_v11 = vld [vmem:[%s2102_s11 + $0x40] sm:$0xf]  ;;  %v1863_v12 = vld [vmem:[%s2102_s11 + $0x44] sm:$0xf0] }
  0x21   : > { %v1688_v13 = vld [vmem:[%s2102_s11 + $0x140] sm:$0xf]  ;;  %v1895_v14 = vld [vmem:[%s2102_s11 + $0x144] sm:$0xf0]  ;;  %v1709_v15 = vor.u32 %v1898_v8, %v1706_v9  ;;  %v1561_v16 = vor.u32 %v1863_v12, %v1560_v11  ;;  %v1866_v18 = vld [vmem:[%s2102_s11 + $0x64] sm:$0xf] }
  0x22   : > { %v1689_v17 = vor.u32 %v1895_v14, %v1688_v13  ;;  %v1714_v21 = vld [vmem:[%s2102_s11 + $0x178] sm:$0xf0]  ;;  %v1568_v23 = vld [vmem:[%s2102_s11 + $0x50] sm:$0xf]  ;;  %v1865_v24 = vld [vmem:[%s2102_s11 + $0x54] sm:$0xf0] }
  0x23   : > { %765 = vmatpush.bf16.msra.mxu0 %v1920_v19  ;;  %1932 = vmatpush.bf16.msra.mxu2 %v1920_v19  ;;  %v1578_v19 = vld [vmem:[%s2102_s11 + $0x68] sm:$0xf0]  ;;  %v1569_v28 = vor.u32 %v1865_v24, %v1568_v23  ;;  %v1868_v30 = vld [vmem:[%s2102_s11 + $0x74] sm:$0xf]  ;;  %v1576_v35 = vld [vmem:[%s2102_s11 + $0x60] sm:$0xf] }
  0x24   : > { %v1581_v22 = vor.u32 %v1866_v18, %v1578_v19  ;;  %v1867_v36 = vld [vmem:[%s2102_s11 + $0x64] sm:$0xf0]  ;;  %v1704_v37 = vld [vmem:[%s2102_s11 + $0x160] sm:$0xf]  ;;  %v1870_v42 = vld [vmem:[%s2102_s11 + $0x84] sm:$0xf] }
  0x25   : > { %v1577_v40 = vor.u32 %v1867_v36, %v1576_v35  ;;  %v1584_v47 = vld [vmem:[%s2102_s11 + $0x70] sm:$0xf]  ;;  %v1869_v48 = vld [vmem:[%s2102_s11 + $0x74] sm:$0xf0]  ;;  %v1602_v58 = vld [vmem:[%s2102_s11 + $0x98] sm:$0xf0] }
  0x26   : > { %v1901_v51 = vld [vmem:[%s2102_s11 + $0x174] sm:$0xf0]  ;;  %v1585_v53 = vor.u32 %v1869_v48, %v1584_v47  ;;  %v1906_v59 = vld [vmem:[%s2102_s11 + $0x1a4] sm:$0xf]  ;;  %v1738_v60 = vld [vmem:[%s2102_s11 + $0x1a8] sm:$0xf0] }
  0x27   : > { %766 = vmatpush.bf16.msra.mxu0 %v1919_v20  ;;  %1933 = vmatpush.bf16.msra.mxu2 %v1919_v20  ;;  %v1900_v20 = vld [vmem:[%s2102_s11 + $0x174] sm:$0xf]  ;;  %v1871_v63 = vld [vmem:[%s2102_s11 + $0x84] sm:$0xf0]  ;;  %v1720_v2 = vld [vmem:[%s2102_s11 + $0x180] sm:$0xf] }
  0x28   : > { %v1717_v27 = vor.u32 %v1900_v20, %v1714_v21  ;;  %s2646_s29 = smov (!%p214_p6, %s1520_s29), 127  ;;  %v1874_v20 = vld [vmem:[%s2102_s11 + $0xa4] sm:$0xf]  ;;  %v1610_v21 = vld [vmem:[%s2102_s11 + $0xa8] sm:$0xf0] }
  0x29   : > { %s217_s16 = sadd.s32 %s1521_s30, %s2646_s29  ;;  %v1746_v23 = vld [vmem:[%s2102_s11 + $0x1b8] sm:$0xf0] }
  0x2a   : > { %s1522_s8 = sshll.u32 %s217_s16, 2 }
  0x2b   : > { %767 = vmatpush.bf16.msra.mxu0 %v1918_v26  ;;  %1934 = vmatpush.bf16.msra.mxu2 %v1918_v26  ;;  %v1897_v26 = vld [vmem:[%s2102_s11 + $0x154] sm:$0xf0]  ;;  %s2240_s12 = scalar_lea.vmem %s2632_s4, %s1522_s8 }
  0x2c   : > { %1819 = vmatmul.msk.bf16.gmra.mxu1 %vm656_vm2, %v1541_v25  ;;  %1836 = vmatmul.msk.bf16.gmra.mxu3 %vm656_vm2, %v1677_v31  ;;  %v1696_v25 = vld [vmem:[%s2102_s11 + $0x150] sm:$0xf]  ;;  %v1586_v31 = vld [vmem:[%s2102_s11 + $0x78] sm:$0xf0] }
  0x2d   : > { %v1697_v29 = vor.u32 %v1897_v26, %v1696_v25  ;;  %v1589_v34 = vor.u32 %v1868_v30, %v1586_v31  ;;  %v1613_v25 = vor.u32 %v1874_v20, %v1610_v21  ;;  %v1600_v26 = vld [vmem:[%s2102_s11 + $0x90] sm:$0xf] }
  0x2e   : > { %768 = vmatmul.bf16.vlgmr.msra.gmra.mxu0 %v1529_v32  ;;  %848 = vmatmul.bf16.vlgmr.msra.gmra.mxu2 %v1657_v33  ;;  %v1902_v32 = vld [vmem:[%s2102_s11 + $0x184] sm:$0xf]  ;;  %v1722_v33 = vld [vmem:[%s2102_s11 + $0x188] sm:$0xf0]  ;;  %v1728_v31 = vld [vmem:[%s2102_s11 + $0x190] sm:$0xf] }
  0x2f   : > { %v1725_v39 = vor.u32 %v1902_v32, %v1722_v33  ;;  %v1905_v32 = vld [vmem:[%s2102_s11 + $0x194] sm:$0xf0] }
  0x3c   : > { %1820 = vmatmul.msk.bf16.gmra.mxu1 %vm656_vm2, %v1549_v38  ;;  %1837 = vmatmul.msk.bf16.gmra.mxu3 %vm656_vm2, %v1685_v43  ;;  %v1899_v38 = vld [vmem:[%s2102_s11 + $0x164] sm:$0xf0]  ;;  %v1594_v43 = vld [vmem:[%s2102_s11 + $0x88] sm:$0xf0] }
  0x3d   : > { %v1705_v41 = vor.u32 %v1899_v38, %v1704_v37  ;;  %v1597_v46 = vor.u32 %v1870_v42, %v1594_v43  ;;  %v1729_v38 = vor.u32 %v1905_v32, %v1728_v31  ;;  %v1878_v32 = vld [vmem:[%s2102_s11 + $0xc4] sm:$0xf] }
  0x3e   : > { %773 = vmatmul.bf16.gmra.mxu0 %v1537_v44  ;;  %853 = vmatmul.bf16.gmra.mxu2 %v1665_v45  ;;  %v1904_v44 = vld [vmem:[%s2102_s11 + $0x194] sm:$0xf]  ;;  %v1730_v45 = vld [vmem:[%s2102_s11 + $0x198] sm:$0xf0] }
  0x3f   : > { %v1733_v52 = vor.u32 %v1904_v44, %v1730_v45 }
  0x4c   : > { %1821 = vmatmul.msk.bf16.gmra.mxu1 %vm656_vm2, %v1557_v50  ;;  %1838 = vmatmul.msk.bf16.gmra.mxu3 %vm656_vm2, %v1693_v55  ;;  %v1712_v50 = vld [vmem:[%s2102_s11 + $0x170] sm:$0xf] }
  0x4d   : > { %v1713_v54 = vor.u32 %v1901_v51, %v1712_v50  ;;  %v1876_v51 = vld [vmem:[%s2102_s11 + $0xb4] sm:$0xf] }
  0x4e   : > { %778 = vmatmul.bf16.gmra.mxu0 %v1545_v56  ;;  %858 = vmatmul.bf16.gmra.mxu2 %v1673_v57  ;;  %v1872_v57 = vld [vmem:[%s2102_s11 + $0x94] sm:$0xf] }
  0x4f   : > { %v1605_v61 = vor.u32 %v1872_v57, %v1602_v58 }
  0x5c   : > { %1822 = vmatmul.msk.bf16.gmra.mxu1 %vm656_vm2, %v1565_v62  ;;  %1839 = vmatmul.msk.bf16.gmra.mxu3 %vm656_vm2, %v1701_v3  ;;  %v1592_v62 = vld [vmem:[%s2102_s11 + $0x80] sm:$0xf]  ;;  %v1903_v3 = vld [vmem:[%s2102_s11 + $0x184] sm:$0xf0] }
  0x5d   : > { %v1593_v6 = vor.u32 %v1871_v63, %v1592_v62  ;;  %v1721_v8 = vor.u32 %v1903_v3, %v1720_v2  ;;  %v1907_v2 = vld [vmem:[%s2102_s11 + $0x1a4] sm:$0xf0] }
  0x5e   : > { %783 = vmatmul.bf16.gmra.mxu0 %v1553_v4  ;;  %863 = vmatmul.bf16.gmra.mxu2 %v1681_v5  ;;  %v1741_v4 = vor.u32 %v1906_v59, %v1738_v60  ;;  %v2222_v5 = vld [vmem:[%s2630_s2] ss:$0 sm:$0xff] }
  0x5f   : > { %v1608_v60 = vld [vmem:[%s2102_s11 + $0xa0] sm:$0xf] }
  0x6c   : > { %1823 = vmatmul.msk.bf16.gmra.mxu1 %vm656_vm2, %v1573_v10  ;;  %1840 = vmatmul.msk.bf16.gmra.mxu3 %vm656_vm2, %v1709_v15  ;;  %v2228_v10 = vld [vmem:[%s2631_s3] ss:$0 sm:$0xff] }
  0x6e   : > { %788 = vmatmul.bf16.gmra.mxu0 %v1561_v16  ;;  %868 = vmatmul.bf16.gmra.mxu2 %v1689_v17 }
  0x7c   : > { %1824 = vmatmul.msk.bf16.gmra.mxu1 %vm656_vm2, %v1581_v22  ;;  %1841 = vmatmul.msk.bf16.gmra.mxu3 %vm656_vm2, %v1717_v27  ;;  %v1908_v22 = vld [vmem:[%s2102_s11 + $0x1b4] sm:$0xf]  ;;  %v1873_v27 = vld [vmem:[%s2102_s11 + $0x94] sm:$0xf0] }
  0x7d   : > { %v1749_v33 = vor.u32 %v1908_v22, %v1746_v23  ;;  %v1601_v36 = vor.u32 %v1873_v27, %v1600_v26 }
  0x7e   : > { %793 = vmatmul.bf16.gmra.mxu0 %v1569_v28  ;;  %873 = vmatmul.bf16.gmra.mxu2 %v1697_v29 }
  0x8c   : > { %1825 = vmatmul.msk.bf16.gmra.mxu1 %vm656_vm2, %v1589_v34  ;;  %1842 = vmatmul.msk.bf16.gmra.mxu3 %vm656_vm2, %v1725_v39 }
  0x8e   : > { %798 = vmatmul.bf16.gmra.mxu0 %v1577_v40  ;;  %878 = vmatmul.bf16.gmra.mxu2 %v1705_v41 }
  0x99   : > { %v938_v49 = vpop.f32.mrf.mxu1 }
  0x9c   : > { %1826 = vmatmul.msk.bf16.gmra.mxu1 %vm656_vm2, %v1597_v46  ;;  %1843 = vmatmul.msk.bf16.gmra.mxu3 %vm656_vm2, %v1733_v52  ;;  %v1618_v52 = vld [vmem:[%s2102_s11 + $0xb8] sm:$0xf0] }
  0x9d   : > { %v1621_v59 = vor.u32 %v1876_v51, %v1618_v52 }
  0x9e   : > { %803 = vmatmul.bf16.gmra.mxu0 %v1585_v53  ;;  %883 = vmatmul.bf16.gmra.mxu2 %v1713_v54  ;;  %v1910_v54 = vld [vmem:[%s2102_s11 + $0x1c4] sm:$0xf] }
  0x9f   : > { %v2205_v55 = vpop.f32.mrf.mxu3 }
  0xa1   : > { %v940_v56 = vpop.f32.mrf.mxu1 }
  0xa7   : > { %v2214_v0 = vpop.f32.mrf.mxu3 }
  0xa9   : > { %v943_v1 = vpop.f32.mrf.mxu1 }
  0xab   : > { %v769_v7 = vpop.f32.mrf.mxu0 }
  0xac   : > { %1827 = vmatmul.msk.bf16.gmra.mxu1 %vm656_vm2, %v1605_v61  ;;  %v939_v9 = vadd.f32 %v938_v49, %v769_v7  ;;  %1844 = vmatmul.msk.bf16.gmra.mxu3 %vm656_vm2, %v1741_v4 }
  0xae   : > { %v1102_v11 = vmul.f32 %v2222_v5, %v939_v9  ;;  %808 = vmatmul.bf16.gmra.mxu0 %v1593_v6  ;;  %888 = vmatmul.bf16.gmra.mxu2 %v1721_v8 }
  0xaf   : > { %v2232_v12 = vpop.f32.mrf.mxu3 }
  0xb0   : > { %v1170_v13 = vadd.f32 %v2228_v10, %v1102_v11 }
  0xb1   : > { %v945_v14 = vpop.f32.mrf.mxu1  ;;  %v2235_v16 = vpop.f32.mrf.mxu2 }
  0xb2   : > { %v1234_v15 = vmax.f32 %v1170_v13, 0.0 }
  0xb3   : > { %v771_v17 = vpop.f32.mrf.mxu0 }
  0xb4   : > { %v1298_v18 = vpack.c.bf16 %v1234_v15, %v1234_v15  ;;  %v941_v19 = vadd.f32 %v940_v56, %v771_v17  ;;  %v1754_v56 = vld [vmem:[%s2102_s11 + $0x1c8] sm:$0xf0] }
  0xb5   : > { %v1757_v3 = vor.u32 %v1910_v54, %v1754_v56 }
  0xb6   : > { %1363 = vst.msk [vmem:[%s2240_s12] sm:$0xf] %vm1362_vm3, %v1298_v18  ;;  %v1103_v24 = vmul.f32 %v2222_v5, %v941_v19 }
  0xb7   : > { %v2251_v28 = vpop.f32.mrf.mxu3 }
  0xb8   : > { %v1171_v29 = vadd.f32 %v2228_v10, %v1103_v24 }
  0xb9   : > { %v948_v30 = vpop.f32.mrf.mxu1  ;;  %v2256_v35 = vpop.f32.mrf.mxu2 }
  0xba   : > { %v1235_v34 = vmax.f32 %v1171_v29, 0.0 }
  0xbb   : > { %v774_v37 = vpop.f32.mrf.mxu0 }
  0xbc   : > { %1828 = vmatmul.msk.bf16.gmra.mxu1 %vm656_vm2, %v1613_v25  ;;  %v1299_v39 = vpack.c.bf16 %v1235_v34, %v1235_v34  ;;  %v944_v40 = vadd.f32 %v943_v1, %v774_v37  ;;  %1845 = vmatmul.msk.bf16.gmra.mxu3 %vm656_vm2, %v1749_v33  ;;  %v1736_v1 = vld [vmem:[%s2102_s11 + $0x1a0] sm:$0xf]  ;;  %v1626_v33 = vld [vmem:[%s2102_s11 + $0xc8] sm:$0xf0]  ;;  %v1762_v37 = vld [vmem:[%s2102_s11 + $0x1d8] sm:$0xf0] }
  0xbe   : > { %1364 = vst.msk [vmem:[%s2240_s12 + $0x4] sm:$0xf] %vm1362_vm3, %v1299_v39  ;;  %v1104_v41 = vmul.f32 %v2222_v5, %v944_v40  ;;  %813 = vmatmul.bf16.gmra.mxu0 %v1601_v36  ;;  %893 = vmatmul.bf16.gmra.mxu2 %v1729_v38  ;;  %v1912_v36 = vld [vmem:[%s2102_s11 + $0x1d4] sm:$0xf]  ;;  %v1616_v40 = vld [vmem:[%s2102_s11 + $0xb0] sm:$0xf] }
  0xbf   : > { %v2263_v42 = vpop.f32.mrf.mxu3 }
  0xc0   : > { %v1172_v43 = vadd.f32 %v2228_v10, %v1104_v41  ;;  %v1877_v41 = vld [vmem:[%s2102_s11 + $0xb4] sm:$0xf0] }
  0xc1   : > { %v950_v44 = vpop.f32.mrf.mxu1  ;;  %v854_v46 = vpop.f32.mrf.mxu2  ;;  %v1617_v52 = vor.u32 %v1877_v41, %v1616_v40 }
  0xc2   : > { %v1236_v45 = vmax.f32 %v1172_v43, 0.0  ;;  %v1024_v47 = vadd.f32 %v2205_v55, %v854_v46  ;;  %v1875_v55 = vld [vmem:[%s2102_s11 + $0xa4] sm:$0xf0]  ;;  %v1744_v46 = vld [vmem:[%s2102_s11 + $0x1b0] sm:$0xf] }
  0xc3   : > { %v776_v48 = vpop.f32.mrf.mxu0  ;;  %v1609_v8 = vor.u32 %v1875_v55, %v1608_v60 }
  0xc4   : > { %v1300_v49 = vpack.c.bf16 %v1236_v45, %v1236_v45  ;;  %v946_v50 = vadd.f32 %v945_v14, %v776_v48  ;;  %v1136_v53 = vmul.f32 %v2222_v5, %v1024_v47  ;;  %v1737_v14 = vor.u32 %v1907_v2, %v1736_v1  ;;  %v1909_v47 = vld [vmem:[%s2102_s11 + $0x1b4] sm:$0xf0] }
  0xc5   : > { %v1765_v48 = vor.u32 %v1912_v36, %v1762_v37 }
  0xc6   : > { %1365 = vst.msk [vmem:[%s2240_s12 + $0x8] sm:$0xf] %vm1362_vm3, %v1300_v49  ;;  %v1105_v57 = vmul.f32 %v2222_v5, %v946_v50  ;;  %v1204_v58 = vadd.f32 %v2228_v10, %v1136_v53 }
  0xc7   : > { %v2278_v61 = vpop.f32.mrf.mxu3 }
  0xc8   : > { %v1173_v62 = vadd.f32 %v2228_v10, %v1105_v57  ;;  %v1268_v4 = vmax.f32 %v1204_v58, 0.0  ;;  %v1745_v57 = vor.u32 %v1909_v47, %v1744_v46 }
  0xc9   : > { %v953_v63 = vpop.f32.mrf.mxu1  ;;  %v856_v7 = vpop.f32.mrf.mxu2 }
  0xca   : > { %v1237_v6 = vmax.f32 %v1173_v62, 0.0  ;;  %v1332_v9 = vpack.c.bf16 %v1268_v4, %v1268_v4  ;;  %v1026_v11 = vadd.f32 %v2214_v0, %v856_v7 }
  0xcb   : > { %v779_v13 = vpop.f32.mrf.mxu0 }
  0xcc   : > { %1829 = vmatmul.msk.bf16.gmra.mxu1 %vm656_vm2, %v1621_v59  ;;  %v1301_v15 = vpack.c.bf16 %v1237_v6, %v1237_v6  ;;  %v949_v17 = vadd.f32 %v948_v30, %v779_v13  ;;  %1846 = vmatmul.msk.bf16.gmra.mxu3 %vm656_vm2, %v1757_v3  ;;  %1397 = vst.msk [vmem:[%s2240_s12 + $0x88] sm:$0xf] %vm1362_vm3, %v1332_v9  ;;  %v1880_v13 = vld [vmem:[%s2102_s11 + $0xd4] sm:$0xf] }
  0xcd   : > { %v1137_v18 = vmul.f32 %v2222_v5, %v1026_v11 }
  0xce   : > { %1366 = vst.msk [vmem:[%s2240_s12 + $0xc] sm:$0xf] %vm1362_vm3, %v1301_v15  ;;  %v1106_v19 = vmul.f32 %v2222_v5, %v949_v17  ;;  %818 = vmatmul.bf16.gmra.mxu0 %v1609_v8  ;;  %898 = vmatmul.bf16.gmra.mxu2 %v1737_v14  ;;  %v1634_v14 = vld [vmem:[%s2102_s11 + $0xd8] sm:$0xf0]  ;;  %v1914_v17 = vld [vmem:[%s2102_s11 + $0x1e4] sm:$0xf] }
  0xcf   : > { %v1205_v0 = vadd.f32 %v2228_v10, %v1137_v18  ;;  %v2293_v20 = vpop.f32.mrf.mxu3  ;;  %v1770_v18 = vld [vmem:[%s2102_s11 + $0x1e8] sm:$0xf0] }
  0xd0   : > { %v1174_v21 = vadd.f32 %v2228_v10, %v1106_v19 }
  0xd1   : > { %v955_v22 = vpop.f32.mrf.mxu1  ;;  %v1269_v23 = vmax.f32 %v1205_v0, 0.0  ;;  %v859_v25 = vpop.f32.mrf.mxu2 }
  0xd2   : > { %v1238_v24 = vmax.f32 %v1174_v21, 0.0  ;;  %v1029_v27 = vadd.f32 %v2232_v12, %v859_v25  ;;  %v1629_v12 = vor.u32 %v1878_v32, %v1626_v33  ;;  %v1624_v21 = vld [vmem:[%s2102_s11 + $0xc0] sm:$0xf] }
  0xd3   : > { %v1333_v26 = vpack.c.bf16 %v1269_v23, %v1269_v23  ;;  %v781_v29 = vpop.f32.mrf.mxu0  ;;  %v1879_v23 = vld [vmem:[%s2102_s11 + $0xc4] sm:$0xf0] }
  0xd4   : > { %v1302_v30 = vpack.c.bf16 %v1238_v24, %v1238_v24  ;;  %v951_v31 = vadd.f32 %v950_v44, %v781_v29  ;;  %v1138_v34 = vmul.f32 %v2222_v5, %v1029_v27  ;;  %v1911_v27 = vld [vmem:[%s2102_s11 + $0x1c4] sm:$0xf0]  ;;  %v1773_v29 = vor.u32 %v1914_v17, %v1770_v18 }
  0xd5   : > { %1398 = vst.msk [vmem:[%s2240_s12 + $0x8c] sm:$0xf] %vm1362_vm3, %v1333_v26  ;;  %v1752_v26 = vld [vmem:[%s2102_s11 + $0x1c0] sm:$0xf]  ;;  %v1625_v33 = vor.u32 %v1879_v23, %v1624_v21 }
  0xd6   : > { %1367 = vst.msk [vmem:[%s2240_s12 + $0x10] sm:$0xf] %vm1362_vm3, %v1302_v30  ;;  %v1107_v38 = vmul.f32 %v2222_v5, %v951_v31  ;;  %v1206_v39 = vadd.f32 %v2228_v10, %v1138_v34 }
  0xd7   : > { %v2310_v43 = vpop.f32.mrf.mxu3 }
  0xd8   : > { %v1175_v44 = vadd.f32 %v2228_v10, %v1107_v38  ;;  %v1270_v49 = vmax.f32 %v1206_v39, 0.0  ;;  %v1753_v38 = vor.u32 %v1911_v27, %v1752_v26 }
  0xd9   : > { %v958_v45 = vpop.f32.mrf.mxu1  ;;  %v861_v51 = vpop.f32.mrf.mxu2 }
  0xda   : > { %v1239_v50 = vmax.f32 %v1175_v44, 0.0  ;;  %v1334_v53 = vpack.c.bf16 %v1270_v49, %v1270_v49  ;;  %v1031_v54 = vadd.f32 %v2251_v28, %v861_v51 }
  0xdb   : > { %v784_v56 = vpop.f32.mrf.mxu0 }
  0xdc   : > { %1830 = vmatmul.msk.bf16.gmra.mxu1 %vm656_vm2, %v1629_v12  ;;  %v1303_v58 = vpack.c.bf16 %v1239_v50, %v1239_v50  ;;  %v954_v59 = vadd.f32 %v953_v63, %v784_v56  ;;  %1847 = vmatmul.msk.bf16.gmra.mxu3 %vm656_vm2, %v1765_v48  ;;  %1399 = vst.msk [vmem:[%s2240_s12 + $0x90] sm:$0xf] %vm1362_vm3, %v1334_v53  ;;  %v1882_v56 = vld [vmem:[%s2102_s11 + $0xe4] sm:$0xf] }
  0xdd   : > { %v1139_v60 = vmul.f32 %v2222_v5, %v1031_v54 }
  0xde   : > { %1368 = vst.msk [vmem:[%s2240_s12 + $0x14] sm:$0xf] %vm1362_vm3, %v1303_v58  ;;  %v1108_v55 = vmul.f32 %v2222_v5, %v954_v59  ;;  %823 = vmatmul.bf16.gmra.mxu0 %v1617_v52  ;;  %903 = vmatmul.bf16.gmra.mxu2 %v1745_v57  ;;  %v1642_v57 = vld [vmem:[%s2102_s11 + $0xe8] sm:$0xf0]  ;;  %v1916_v59 = vld [vmem:[%s2102_s11 + $0x1f4] sm:$0xf] }
  0xdf   : > { %v1207_v28 = vadd.f32 %v2228_v10, %v1139_v60  ;;  %v2325_v62 = vpop.f32.mrf.mxu3  ;;  %v1778_v60 = vld [vmem:[%s2102_s11 + $0x1f8] sm:$0xf0] }
  0xe0   : > { %v1176_v63 = vadd.f32 %v2228_v10, %v1108_v55 }
  0xe1   : > { %v960_v1 = vpop.f32.mrf.mxu1  ;;  %v1271_v2 = vmax.f32 %v1207_v28, 0.0  ;;  %v864_v4 = vpop.f32.mrf.mxu2 }
  0xe2   : > { %v1240_v3 = vmax.f32 %v1176_v63, 0.0  ;;  %v1034_v7 = vadd.f32 %v2263_v42, %v864_v4  ;;  %v1637_v42 = vor.u32 %v1880_v13, %v1634_v14  ;;  %v1632_v63 = vld [vmem:[%s2102_s11 + $0xd0] sm:$0xf] }
  0xe3   : > { %v1335_v6 = vpack.c.bf16 %v1271_v2, %v1271_v2  ;;  %v786_v8 = vpop.f32.mrf.mxu0  ;;  %v1881_v2 = vld [vmem:[%s2102_s11 + $0xd4] sm:$0xf0] }
  0xe4   : > { %v1304_v9 = vpack.c.bf16 %v1240_v3, %v1240_v3  ;;  %v956_v11 = vadd.f32 %v955_v22, %v786_v8  ;;  %v1140_v15 = vmul.f32 %v2222_v5, %v1034_v7  ;;  %v1913_v7 = vld [vmem:[%s2102_s11 + $0x1d4] sm:$0xf0]  ;;  %v1781_v8 = vor.u32 %v1916_v59, %v1778_v60 }
  0xe5   : > { %1400 = vst.msk [vmem:[%s2240_s12 + $0x94] sm:$0xf] %vm1362_vm3, %v1335_v6  ;;  %v1760_v6 = vld [vmem:[%s2102_s11 + $0x1d0] sm:$0xf]  ;;  %v1633_v14 = vor.u32 %v1881_v2, %v1632_v63 }
  0xe6   : > { %1369 = vst.msk [vmem:[%s2240_s12 + $0x18] sm:$0xf] %vm1362_vm3, %v1304_v9  ;;  %v1109_v19 = vmul.f32 %v2222_v5, %v956_v11  ;;  %v1208_v0 = vadd.f32 %v2228_v10, %v1140_v15 }
  0xe7   : > { %v2342_v22 = vpop.f32.mrf.mxu3 }
  0xe8   : > { %v1177_v24 = vadd.f32 %v2228_v10, %v1109_v19  ;;  %v1272_v30 = vmax.f32 %v1208_v0, 0.0  ;;  %v1761_v19 = vor.u32 %v1913_v7, %v1760_v6 }
  0xe9   : > { %v963_v25 = vpop.f32.mrf.mxu1  ;;  %v866_v32 = vpop.f32.mrf.mxu2 }
  0xea   : > { %v1241_v31 = vmax.f32 %v1177_v24, 0.0  ;;  %v1336_v34 = vpack.c.bf16 %v1272_v30, %v1272_v30  ;;  %v1036_v36 = vadd.f32 %v2278_v61, %v866_v32 }
  0xeb   : > { %v789_v37 = vpop.f32.mrf.mxu0 }
  0xec   : > { %1831 = vmatmul.msk.bf16.gmra.mxu1 %vm656_vm2, %v1637_v42  ;;  %v1305_v39 = vpack.c.bf16 %v1241_v31, %v1241_v31  ;;  %v959_v12 = vadd.f32 %v958_v45, %v789_v37  ;;  %1848 = vmatmul.msk.bf16.gmra.mxu3 %vm656_vm2, %v1773_v29  ;;  %1401 = vst.msk [vmem:[%s2240_s12 + $0x98] sm:$0xf] %vm1362_vm3, %v1336_v34  ;;  %v1884_v37 = vld [vmem:[%s2102_s11 + $0xf4] sm:$0xf] }
  0xed   : > { %v1141_v40 = vmul.f32 %v2222_v5, %v1036_v36 }
  0xee   : > { %1370 = vst.msk [vmem:[%s2240_s12 + $0x1c] sm:$0xf] %vm1362_vm3, %v1305_v39  ;;  %v1110_v41 = vmul.f32 %v2222_v5, %v959_v12  ;;  %828 = vmatmul.bf16.gmra.mxu0 %v1625_v33  ;;  %908 = vmatmul.bf16.gmra.mxu2 %v1753_v38  ;;  %v1650_v38 = vld [vmem:[%s2102_s11 + $0xf8] sm:$0xf0] }
  0xef   : > { %v1209_v61 = vadd.f32 %v2228_v10, %v1141_v40  ;;  %v2357_v44 = vpop.f32.mrf.mxu3 }
  0xf0   : > { %v1178_v45 = vadd.f32 %v2228_v10, %v1110_v41  ;;  %v1653_v41 = vor.u32 %v1884_v37, %v1650_v38 }
  0xf1   : > { %v965_v46 = vpop.f32.mrf.mxu1  ;;  %v1273_v47 = vmax.f32 %v1209_v61, 0.0  ;;  %v869_v49 = vpop.f32.mrf.mxu2  ;;  %v1640_v61 = vld [vmem:[%s2102_s11 + $0xe0] sm:$0xf] }
  0xf2   : > { %v1242_v48 = vmax.f32 %v1178_v45, 0.0  ;;  %v1039_v51 = vadd.f32 %v2293_v20, %v869_v49  ;;  %v1645_v20 = vor.u32 %v1882_v56, %v1642_v57 }
  0xf3   : > { %v1337_v50 = vpack.c.bf16 %v1273_v47, %v1273_v47  ;;  %v791_v52 = vpop.f32.mrf.mxu0 }
  0xf4   : > { %v1306_v53 = vpack.c.bf16 %v1242_v48, %v1242_v48  ;;  %v961_v54 = vadd.f32 %v960_v1, %v791_v52  ;;  %v1142_v58 = vmul.f32 %v2222_v5, %v1039_v51  ;;  %v1915_v48 = vld [vmem:[%s2102_s11 + $0x1e4] sm:$0xf0] }
  0xf5   : > { %1402 = vst.msk [vmem:[%s2240_s12 + $0x9c] sm:$0xf] %vm1362_vm3, %v1337_v50 }
  0xf6   : > { %1371 = vst.msk [vmem:[%s2240_s12 + $0x20] sm:$0xf] %vm1362_vm3, %v1306_v53  ;;  %v1111_v55 = vmul.f32 %v2222_v5, %v961_v54  ;;  %v1210_v28 = vadd.f32 %v2228_v10, %v1142_v58 }
  0xf7   : > { %v2374_v1 = vpop.f32.mrf.mxu3 }
  0xf8   : > { %v1179_v3 = vadd.f32 %v2228_v10, %v1111_v55  ;;  %v1274_v9 = vmax.f32 %v1210_v28, 0.0 }
  0xf9   : > { %v968_v4 = vpop.f32.mrf.mxu1  ;;  %v871_v13 = vpop.f32.mrf.mxu2 }
  0xfa   : > { %v1243_v11 = vmax.f32 %v1179_v3, 0.0  ;;  %v1338_v15 = vpack.c.bf16 %v1274_v9, %v1274_v9  ;;  %v1041_v17 = vadd.f32 %v2310_v43, %v871_v13  ;;  %v1886_v13 = vld [vmem:[%s2102_s11 + $0x104] sm:$0xf] }
  0xfb   : > { %v794_v18 = vpop.f32.mrf.mxu0 }
  0xfc   : > { %1832 = vmatmul.msk.bf16.gmra.mxu1 %vm656_vm2, %v1645_v20  ;;  %v1307_v0 = vpack.c.bf16 %v1243_v11, %v1243_v11  ;;  %v964_v42 = vadd.f32 %v963_v25, %v794_v18  ;;  %1849 = vmatmul.msk.bf16.gmra.mxu3 %vm656_vm2, %v1781_v8  ;;  %1403 = vst.msk [vmem:[%s2240_s12 + $0xa0] sm:$0xf] %vm1362_vm3, %v1338_v15 }
  0xfd   : > { %v1143_v21 = vmul.f32 %v2222_v5, %v1041_v17 }
  0xfe   : > { %1372 = vst.msk [vmem:[%s2240_s12 + $0x24] sm:$0xf] %vm1362_vm3, %v1307_v0  ;;  %v1112_v23 = vmul.f32 %v2222_v5, %v964_v42  ;;  %833 = vmatmul.bf16.gmra.mxu0 %v1633_v14  ;;  %913 = vmatmul.bf16.gmra.mxu2 %v1761_v19  ;;  %v1658_v14 = vld [vmem:[%s2102_s11 + $0x108] sm:$0xf0]  ;;  %v1648_v0 = vld [vmem:[%s2102_s11 + $0xf0] sm:$0xf] }
  0xff   : > { %v1211_v43 = vadd.f32 %v2228_v10, %v1143_v21  ;;  %v2390_v26 = vpop.f32.mrf.mxu3  ;;  %v1885_v42 = vld [vmem:[%s2102_s11 + $0xf4] sm:$0xf0] }
 0x100   : > { %v1180_v24 = vadd.f32 %v2228_v10, %v1112_v23 }
 0x101   : > { %v970_v25 = vpop.f32.mrf.mxu1  ;;  %v1275_v27 = vmax.f32 %v1211_v43, 0.0  ;;  %v874_v30 = vpop.f32.mrf.mxu2  ;;  %v1776_v43 = vld [vmem:[%s2102_s11 + $0x1f0] sm:$0xf] }
 0x102   : > { %v1244_v29 = vmax.f32 %v1180_v24, 0.0  ;;  %v1044_v32 = vadd.f32 %v2325_v62, %v874_v30  ;;  %v1883_v62 = vld [vmem:[%s2102_s11 + $0xe4] sm:$0xf0]  ;;  %v1917_v24 = vld [vmem:[%s2102_s11 + $0x1f4] sm:$0xf0]  ;;  %v1649_v30 = vor.u32 %v1885_v42, %v1648_v0 }
 0x103   : > { %v1339_v31 = vpack.c.bf16 %v1275_v27, %v1275_v27  ;;  %v796_v33 = vpop.f32.mrf.mxu0  ;;  %v1641_v52 = vor.u32 %v1883_v62, %v1640_v61 }
 0x104   : > { %v1308_v34 = vpack.c.bf16 %v1244_v29, %v1244_v29  ;;  %v966_v36 = vadd.f32 %v965_v46, %v796_v33  ;;  %v1144_v39 = vmul.f32 %v2222_v5, %v1044_v32  ;;  %v1768_v46 = vld [vmem:[%s2102_s11 + $0x1e0] sm:$0xf] }
 0x105   : > { %1404 = vst.msk [vmem:[%s2240_s12 + $0xa4] sm:$0xf] %vm1362_vm3, %v1339_v31  ;;  %v1769_v58 = vor.u32 %v1915_v48, %v1768_v46 }
 0x106   : > { %1373 = vst.msk [vmem:[%s2240_s12 + $0x28] sm:$0xf] %vm1362_vm3, %v1308_v34  ;;  %v1113_v12 = vmul.f32 %v2222_v5, %v966_v36  ;;  %v1212_v40 = vadd.f32 %v2228_v10, %v1144_v39  ;;  %v1777_v34 = vor.u32 %v1917_v24, %v1776_v43 }
 0x107   : > { %v2407_v53 = vpop.f32.mrf.mxu3 }
 0x108   : > { %v1181_v45 = vadd.f32 %v2228_v10, %v1113_v12  ;;  %v1276_v49 = vmax.f32 %v1212_v40, 0.0 }
 0x109   : > { %v973_v47 = vpop.f32.mrf.mxu1  ;;  %v876_v51 = vpop.f32.mrf.mxu2 }
 0x10a   : > { %v1245_v50 = vmax.f32 %v1181_v45, 0.0  ;;  %v1340_v54 = vpack.c.bf16 %v1276_v49, %v1276_v49  ;;  %v1046_v56 = vadd.f32 %v2342_v22, %v876_v51 }
 0x10b   : > { %v799_v57 = vpop.f32.mrf.mxu0 }
 0x10c   : > { %1833 = vmatmul.msk.bf16.gmra.mxu1 %vm656_vm2, %v1653_v41  ;;  %v1309_v59 = vpack.c.bf16 %v1245_v50, %v1245_v50  ;;  %v969_v60 = vadd.f32 %v968_v4, %v799_v57  ;;  %1405 = vst.msk [vmem:[%s2240_s12 + $0xa8] sm:$0xf] %vm1362_vm3, %v1340_v54  ;;  %v1145_v55 = vmul.f32 %v2222_v5, %v1046_v56 }
 0x10e   : > { %1374 = vst.msk [vmem:[%s2240_s12 + $0x2c] sm:$0xf] %vm1362_vm3, %v1309_v59  ;;  %v1114_v28 = vmul.f32 %v2222_v5, %v969_v60  ;;  %838 = vmatmul.bf16.gmra.mxu0 %v1641_v52  ;;  %v1213_v22 = vadd.f32 %v2228_v10, %v1145_v55  ;;  %918 = vmatmul.bf16.gmra.mxu2 %v1769_v58 }
 0x10f   : > { %v2422_v15 = vpop.f32.mrf.mxu3 }
 0x110   : > { %v1182_v20 = vadd.f32 %v2228_v10, %v1114_v28  ;;  %v1277_v2 = vmax.f32 %v1213_v22, 0.0 }
 0x111   : > { %v975_v63 = vpop.f32.mrf.mxu1  ;;  %v879_v4 = vpop.f32.mrf.mxu2 }
 0x112   : > { %v1246_v3 = vmax.f32 %v1182_v20, 0.0  ;;  %v1341_v6 = vpack.c.bf16 %v1277_v2, %v1277_v2  ;;  %v1049_v7 = vadd.f32 %v2357_v44, %v879_v4  ;;  %v1661_v44 = vor.u32 %v1886_v13, %v1658_v14 }
 0x113   : > { %v801_v8 = vpop.f32.mrf.mxu0 }
 0x114   : > { %v1310_v9 = vpack.c.bf16 %v1246_v3, %v1246_v3  ;;  %v971_v11 = vadd.f32 %v970_v25, %v801_v8  ;;  %1406 = vst.msk [vmem:[%s2240_s12 + $0xac] sm:$0xf] %vm1362_vm3, %v1341_v6  ;;  %v1146_v17 = vmul.f32 %v2222_v5, %v1049_v7 }
 0x116   : > { %1375 = vst.msk [vmem:[%s2240_s12 + $0x30] sm:$0xf] %vm1362_vm3, %v1310_v9  ;;  %v1115_v18 = vmul.f32 %v2222_v5, %v971_v11  ;;  %v1214_v19 = vadd.f32 %v2228_v10, %v1146_v17 }
 0x117   : > { %v1060_v12 = vpop.f32.mrf.mxu3 }
 0x118   : > { %v1183_v21 = vadd.f32 %v2228_v10, %v1115_v18  ;;  %v1278_v25 = vmax.f32 %v1214_v19, 0.0 }
 0x119   : > { %v978_v23 = vpop.f32.mrf.mxu1  ;;  %v881_v29 = vpop.f32.mrf.mxu2 }
 0x11a   : > { %v1247_v27 = vmax.f32 %v1183_v21, 0.0  ;;  %v1342_v31 = vpack.c.bf16 %v1278_v25, %v1278_v25  ;;  %v1051_v32 = vadd.f32 %v2374_v1, %v881_v29 }
 0x11b   : > { %v804_v33 = vpop.f32.mrf.mxu0 }
 0x11c   : > { %1834 = vmatmul.msk.bf16.gmra.mxu1 %vm656_vm2, %v1661_v44  ;;  %v1311_v36 = vpack.c.bf16 %v1247_v27, %v1247_v27  ;;  %v974_v37 = vadd.f32 %v973_v47, %v804_v33  ;;  %1407 = vst.msk [vmem:[%s2240_s12 + $0xb0] sm:$0xf] %vm1362_vm3, %v1342_v31  ;;  %v1147_v38 = vmul.f32 %v2222_v5, %v1051_v32 }
 0x11e   : > { %1376 = vst.msk [vmem:[%s2240_s12 + $0x34] sm:$0xf] %vm1362_vm3, %v1311_v36  ;;  %v1116_v39 = vmul.f32 %v2222_v5, %v974_v37  ;;  %843 = vmatmul.bf16.gmra.mxu0 %v1649_v30  ;;  %v1215_v1 = vadd.f32 %v2228_v10, %v1147_v38  ;;  %923 = vmatmul.bf16.gmra.mxu2 %v1777_v34 }
 0x11f   : > { %v1063_v58 = vpop.f32.mrf.mxu3 }
 0x120   : > { %v1184_v40 = vadd.f32 %v2228_v10, %v1116_v39  ;;  %v1279_v61 = vmax.f32 %v1215_v1, 0.0 }
 0x121   : > { %v980_v41 = vpop.f32.mrf.mxu1  ;;  %v884_v45 = vpop.f32.mrf.mxu2 }
 0x122   : > { %v1248_v62 = vmax.f32 %v1184_v40, 0.0  ;;  %v1343_v47 = vpack.c.bf16 %v1279_v61, %v1279_v61  ;;  %v1054_v46 = vadd.f32 %v2390_v26, %v884_v45 }
 0x123   : > { %v806_v48 = vpop.f32.mrf.mxu0 }
 0x124   : > { %v1312_v49 = vpack.c.bf16 %v1248_v62, %v1248_v62  ;;  %v976_v50 = vadd.f32 %v975_v63, %v806_v48  ;;  %1408 = vst.msk [vmem:[%s2240_s12 + $0xb4] sm:$0xf] %vm1362_vm3, %v1343_v47  ;;  %v1148_v51 = vmul.f32 %v2222_v5, %v1054_v46 }
 0x126   : > { %1377 = vst.msk [vmem:[%s2240_s12 + $0x38] sm:$0xf] %vm1362_vm3, %v1312_v49  ;;  %v1117_v52 = vmul.f32 %v2222_v5, %v976_v50  ;;  %v1216_v54 = vadd.f32 %v2228_v10, %v1148_v51 }
 0x127   : > { %v1065_v11 = vpop.f32.mrf.mxu3 }
 0x128   : > { %v1185_v56 = vadd.f32 %v2228_v10, %v1117_v52  ;;  %v1280_v26 = vmax.f32 %v1216_v54, 0.0 }
 0x129   : > { %v983_v57 = vpop.f32.mrf.mxu1  ;;  %v886_v60 = vpop.f32.mrf.mxu2 }
 0x12a   : > { %v1249_v59 = vmax.f32 %v1185_v56, 0.0  ;;  %v1344_v55 = vpack.c.bf16 %v1280_v26, %v1280_v26  ;;  %v1056_v28 = vadd.f32 %v2407_v53, %v886_v60 }
 0x12b   : > { %v809_v22 = vpop.f32.mrf.mxu0 }
 0x12c   : > { %v1313_v20 = vpack.c.bf16 %v1249_v59, %v1249_v59  ;;  %v979_v63 = vadd.f32 %v978_v23, %v809_v22  ;;  %1409 = vst.msk [vmem:[%s2240_s12 + $0xb8] sm:$0xf] %vm1362_vm3, %v1344_v55  ;;  %v1149_v2 = vmul.f32 %v2222_v5, %v1056_v28 }
 0x12e   : > { %1378 = vst.msk [vmem:[%s2240_s12 + $0x3c] sm:$0xf] %vm1362_vm3, %v1313_v20  ;;  %v1118_v3 = vmul.f32 %v2222_v5, %v979_v63  ;;  %v1217_v4 = vadd.f32 %v2228_v10, %v1149_v2 }
 0x12f   : > { %v1068_v32 = vpop.f32.mrf.mxu3 }
 0x130   : > { %v1186_v6 = vadd.f32 %v2228_v10, %v1118_v3  ;;  %v1281_v8 = vmax.f32 %v1217_v4, 0.0 }
 0x131   : > { %v985_v7 = vpop.f32.mrf.mxu1  ;;  %v889_v9 = vpop.f32.mrf.mxu2 }
 0x132   : > { %v1250_v53 = vmax.f32 %v1186_v6, 0.0  ;;  %v1345_v13 = vpack.c.bf16 %v1281_v8, %v1281_v8  ;;  %v1059_v14 = vadd.f32 %v2422_v15, %v889_v9 }
 0x133   : > { %v811_v17 = vpop.f32.mrf.mxu0 }
 0x134   : > { %v1314_v18 = vpack.c.bf16 %v1250_v53, %v1250_v53  ;;  %v981_v19 = vadd.f32 %v980_v41, %v811_v17  ;;  %1410 = vst.msk [vmem:[%s2240_s12 + $0xbc] sm:$0xf] %vm1362_vm3, %v1345_v13  ;;  %v1150_v44 = vmul.f32 %v2222_v5, %v1059_v14 }
 0x136   : > { %1379 = vst.msk [vmem:[%s2240_s12 + $0x40] sm:$0xf] %vm1362_vm3, %v1314_v18  ;;  %v1119_v0 = vmul.f32 %v2222_v5, %v981_v19  ;;  %v1218_v42 = vadd.f32 %v2228_v10, %v1150_v44 }
 0x137   : > { %v1070_v48 = vpop.f32.mrf.mxu3 }
 0x138   : > { %v1187_v21 = vadd.f32 %v2228_v10, %v1119_v0  ;;  %v1282_v43 = vmax.f32 %v1218_v42, 0.0 }
 0x139   : > { %v988_v23 = vpop.f32.mrf.mxu1  ;;  %v891_v24 = vpop.f32.mrf.mxu2 }
 0x13a   : > { %v1251_v15 = vmax.f32 %v1187_v21, 0.0  ;;  %v1346_v25 = vpack.c.bf16 %v1282_v43, %v1282_v43  ;;  %v1061_v27 = vadd.f32 %v1060_v12, %v891_v24 }
 0x13b   : > { %v814_v29 = vpop.f32.mrf.mxu0 }
 0x13c   : > { %v1315_v30 = vpack.c.bf16 %v1251_v15, %v1251_v15  ;;  %v984_v31 = vadd.f32 %v983_v57, %v814_v29  ;;  %1411 = vst.msk [vmem:[%s2240_s12 + $0xc0] sm:$0xf] %vm1362_vm3, %v1346_v25  ;;  %v1151_v33 = vmul.f32 %v2222_v5, %v1061_v27 }
 0x13e   : > { %1380 = vst.msk [vmem:[%s2240_s12 + $0x44] sm:$0xf] %vm1362_vm3, %v1315_v30  ;;  %v1120_v34 = vmul.f32 %v2222_v5, %v984_v31  ;;  %v1219_v36 = vadd.f32 %v2228_v10, %v1151_v33 }
 0x13f   : > { %v1073_v2 = vpop.f32.mrf.mxu3 }
 0x140   : > { %v1188_v37 = vadd.f32 %v2228_v10, %v1120_v34  ;;  %v1283_v39 = vmax.f32 %v1219_v36, 0.0 }
 0x141   : > { %v990_v38 = vpop.f32.mrf.mxu1  ;;  %v894_v1 = vpop.f32.mrf.mxu2 }
 0x142   : > { %v1252_v12 = vmax.f32 %v1188_v37, 0.0  ;;  %v1347_v40 = vpack.c.bf16 %v1283_v39, %v1283_v39  ;;  %v1064_v41 = vadd.f32 %v1063_v58, %v894_v1 }
 0x143   : > { %v816_v61 = vpop.f32.mrf.mxu0 }
 0x144   : > { %v1316_v62 = vpack.c.bf16 %v1252_v12, %v1252_v12  ;;  %v986_v45 = vadd.f32 %v985_v7, %v816_v61  ;;  %1412 = vst.msk [vmem:[%s2240_s12 + $0xc4] sm:$0xf] %vm1362_vm3, %v1347_v40  ;;  %v1152_v47 = vmul.f32 %v2222_v5, %v1064_v41 }
 0x146   : > { %1381 = vst.msk [vmem:[%s2240_s12 + $0x48] sm:$0xf] %vm1362_vm3, %v1316_v62  ;;  %v1121_v46 = vmul.f32 %v2222_v5, %v986_v45  ;;  %v1220_v49 = vadd.f32 %v2228_v10, %v1152_v47 }
 0x147   : > { %v1075_v21 = vpop.f32.mrf.mxu3 }
 0x148   : > { %v1189_v50 = vadd.f32 %v2228_v10, %v1121_v46  ;;  %v1284_v52 = vmax.f32 %v1220_v49, 0.0 }
 0x149   : > { %v993_v51 = vpop.f32.mrf.mxu1  ;;  %v896_v56 = vpop.f32.mrf.mxu2 }
 0x14a   : > { %v1253_v54 = vmax.f32 %v1189_v50, 0.0  ;;  %v1348_v57 = vpack.c.bf16 %v1284_v52, %v1284_v52  ;;  %v1066_v58 = vadd.f32 %v1065_v11, %v896_v56 }
 0x14b   : > { %v819_v26 = vpop.f32.mrf.mxu0 }
 0x14c   : > { %v1317_v59 = vpack.c.bf16 %v1253_v54, %v1253_v54  ;;  %v989_v60 = vadd.f32 %v988_v23, %v819_v26  ;;  %1413 = vst.msk [vmem:[%s2240_s12 + $0xc8] sm:$0xf] %vm1362_vm3, %v1348_v57  ;;  %v1153_v55 = vmul.f32 %v2222_v5, %v1066_v58 }
 0x14e   : > { %1382 = vst.msk [vmem:[%s2240_s12 + $0x4c] sm:$0xf] %vm1362_vm3, %v1317_v59  ;;  %v1122_v28 = vmul.f32 %v2222_v5, %v989_v60  ;;  %v1221_v22 = vadd.f32 %v2228_v10, %v1153_v55 }
 0x14f   : > { %v1078_v40 = vpop.f32.mrf.mxu3 }
 0x150   : > { %v1190_v20 = vadd.f32 %v2228_v10, %v1122_v28  ;;  %v1285_v3 = vmax.f32 %v1221_v22, 0.0 }
 0x151   : > { %v995_v63 = vpop.f32.mrf.mxu1  ;;  %v899_v6 = vpop.f32.mrf.mxu2 }
 0x152   : > { %v1254_v4 = vmax.f32 %v1190_v20, 0.0  ;;  %v1349_v7 = vpack.c.bf16 %v1285_v3, %v1285_v3  ;;  %v1069_v8 = vadd.f32 %v1068_v32, %v899_v6 }
 0x153   : > { %v821_v53 = vpop.f32.mrf.mxu0 }
 0x154   : > { %v1318_v9 = vpack.c.bf16 %v1254_v4, %v1254_v4  ;;  %v991_v11 = vadd.f32 %v990_v38, %v821_v53  ;;  %1414 = vst.msk [vmem:[%s2240_s12 + $0xcc] sm:$0xf] %vm1362_vm3, %v1349_v7  ;;  %v1154_v13 = vmul.f32 %v2222_v5, %v1069_v8 }
 0x156   : > { %1383 = vst.msk [vmem:[%s2240_s12 + $0x50] sm:$0xf] %vm1362_vm3, %v1318_v9  ;;  %v1123_v14 = vmul.f32 %v2222_v5, %v991_v11  ;;  %v1222_v17 = vadd.f32 %v2228_v10, %v1154_v13 }
 0x157   : > { %v1080_v26 = vpop.f32.mrf.mxu3 }
 0x158   : > { %v1191_v18 = vadd.f32 %v2228_v10, %v1123_v14  ;;  %v1286_v44 = vmax.f32 %v1222_v17, 0.0 }
 0x159   : > { %v998_v19 = vpop.f32.mrf.mxu1  ;;  %v901_v42 = vpop.f32.mrf.mxu2 }
 0x15a   : > { %v1255_v0 = vmax.f32 %v1191_v18, 0.0  ;;  %v1350_v23 = vpack.c.bf16 %v1286_v44, %v1286_v44  ;;  %v1071_v43 = vadd.f32 %v1070_v48, %v901_v42 }
 0x15b   : > { %v824_v15 = vpop.f32.mrf.mxu0 }
 0x15c   : > { %v1319_v24 = vpack.c.bf16 %v1255_v0, %v1255_v0  ;;  %v994_v25 = vadd.f32 %v993_v51, %v824_v15  ;;  %1415 = vst.msk [vmem:[%s2240_s12 + $0xd0] sm:$0xf] %vm1362_vm3, %v1350_v23  ;;  %v1155_v27 = vmul.f32 %v2222_v5, %v1071_v43 }
 0x15e   : > { %1384 = vst.msk [vmem:[%s2240_s12 + $0x54] sm:$0xf] %vm1362_vm3, %v1319_v24  ;;  %v1124_v29 = vmul.f32 %v2222_v5, %v994_v25  ;;  %v1223_v30 = vadd.f32 %v2228_v10, %v1155_v27 }
 0x15f   : > { %v1083_v13 = vpop.f32.mrf.mxu3 }
 0x160   : > { %v1192_v31 = vadd.f32 %v2228_v10, %v1124_v29  ;;  %v1287_v33 = vmax.f32 %v1223_v30, 0.0 }
 0x161   : > { %v1000_v32 = vpop.f32.mrf.mxu1  ;;  %v904_v36 = vpop.f32.mrf.mxu2 }
 0x162   : > { %v1256_v34 = vmax.f32 %v1192_v31, 0.0  ;;  %v1351_v37 = vpack.c.bf16 %v1287_v33, %v1287_v33  ;;  %v1074_v38 = vadd.f32 %v1073_v2, %v904_v36 }
 0x163   : > { %v826_v39 = vpop.f32.mrf.mxu0 }
 0x164   : > { %v1320_v12 = vpack.c.bf16 %v1256_v34, %v1256_v34  ;;  %v996_v1 = vadd.f32 %v995_v63, %v826_v39  ;;  %1416 = vst.msk [vmem:[%s2240_s12 + $0xd4] sm:$0xf] %vm1362_vm3, %v1351_v37  ;;  %v1156_v41 = vmul.f32 %v2222_v5, %v1074_v38 }
 0x166   : > { %1385 = vst.msk [vmem:[%s2240_s12 + $0x58] sm:$0xf] %vm1362_vm3, %v1320_v12  ;;  %v1125_v61 = vmul.f32 %v2222_v5, %v996_v1  ;;  %v1224_v62 = vadd.f32 %v2228_v10, %v1156_v41 }
 0x167   : > { %v1085_v31 = vpop.f32.mrf.mxu3 }
 0x168   : > { %v1193_v45 = vadd.f32 %v2228_v10, %v1125_v61  ;;  %v1288_v46 = vmax.f32 %v1224_v62, 0.0 }
 0x169   : > { %v1003_v47 = vpop.f32.mrf.mxu1  ;;  %v906_v49 = vpop.f32.mrf.mxu2 }
 0x16a   : > { %v1257_v48 = vmax.f32 %v1193_v45, 0.0  ;;  %v1352_v50 = vpack.c.bf16 %v1288_v46, %v1288_v46  ;;  %v1076_v51 = vadd.f32 %v1075_v21, %v906_v49 }
 0x16b   : > { %v829_v52 = vpop.f32.mrf.mxu0 }
 0x16c   : > { %v1321_v54 = vpack.c.bf16 %v1257_v48, %v1257_v48  ;;  %v999_v56 = vadd.f32 %v998_v19, %v829_v52  ;;  %1417 = vst.msk [vmem:[%s2240_s12 + $0xd8] sm:$0xf] %vm1362_vm3, %v1352_v50  ;;  %v1157_v57 = vmul.f32 %v2222_v5, %v1076_v51 }
 0x16e   : > { %1386 = vst.msk [vmem:[%s2240_s12 + $0x5c] sm:$0xf] %vm1362_vm3, %v1321_v54  ;;  %v1126_v58 = vmul.f32 %v2222_v5, %v999_v56  ;;  %v1225_v59 = vadd.f32 %v2228_v10, %v1157_v57 }
 0x16f   : > { %v1088_v49 = vpop.f32.mrf.mxu3 }
 0x170   : > { %v1194_v60 = vadd.f32 %v2228_v10, %v1126_v58  ;;  %v1289_v28 = vmax.f32 %v1225_v59, 0.0 }
 0x171   : > { %v1005_v55 = vpop.f32.mrf.mxu1  ;;  %v909_v20 = vpop.f32.mrf.mxu2 }
 0x172   : > { %v1258_v22 = vmax.f32 %v1194_v60, 0.0  ;;  %v1353_v63 = vpack.c.bf16 %v1289_v28, %v1289_v28  ;;  %v1079_v2 = vadd.f32 %v1078_v40, %v909_v20 }
 0x173   : > { %v831_v3 = vpop.f32.mrf.mxu0 }
 0x174   : > { %v1322_v4 = vpack.c.bf16 %v1258_v22, %v1258_v22  ;;  %v1001_v6 = vadd.f32 %v1000_v32, %v831_v3  ;;  %1418 = vst.msk [vmem:[%s2240_s12 + $0xdc] sm:$0xf] %vm1362_vm3, %v1353_v63  ;;  %v1158_v7 = vmul.f32 %v2222_v5, %v1079_v2 }
 0x176   : > { %1387 = vst.msk [vmem:[%s2240_s12 + $0x60] sm:$0xf] %vm1362_vm3, %v1322_v4  ;;  %v1127_v8 = vmul.f32 %v2222_v5, %v1001_v6  ;;  %v1226_v53 = vadd.f32 %v2228_v10, %v1158_v7  ;;  %v2542_v5 = vld [vmem:[%s2630_s2] ss:$0 sm:$0xff] }
 0x177   : > { %v1090_v2 = vpop.f32.mrf.mxu3 }
 0x178   : > { %v1195_v9 = vadd.f32 %v2228_v10, %v1127_v8  ;;  %v1290_v14 = vmax.f32 %v1226_v53, 0.0 }
 0x179   : > { %v1008_v11 = vpop.f32.mrf.mxu1  ;;  %v911_v18 = vpop.f32.mrf.mxu2 }
 0x17a   : > { %v1259_v17 = vmax.f32 %v1195_v9, 0.0  ;;  %v1354_v19 = vpack.c.bf16 %v1290_v14, %v1290_v14  ;;  %v1081_v44 = vadd.f32 %v1080_v26, %v911_v18 }
 0x17b   : > { %v834_v0 = vpop.f32.mrf.mxu0 }
 0x17c   : > { %v1323_v42 = vpack.c.bf16 %v1259_v17, %v1259_v17  ;;  %v1004_v21 = vadd.f32 %v1003_v47, %v834_v0  ;;  %1419 = vst.msk [vmem:[%s2240_s12 + $0xe0] sm:$0xf] %vm1362_vm3, %v1354_v19  ;;  %v1159_v23 = vmul.f32 %v2542_v5, %v1081_v44 }
 0x17e   : > { %1388 = vst.msk [vmem:[%s2240_s12 + $0x64] sm:$0xf] %vm1362_vm3, %v1323_v42  ;;  %v1128_v43 = vmul.f32 %v2542_v5, %v1004_v21  ;;  %v1227_v15 = vadd.f32 %v2228_v10, %v1159_v23 }
 0x180   : > { %v1196_v24 = vadd.f32 %v2228_v10, %v1128_v43  ;;  %v1291_v27 = vmax.f32 %v1227_v15, 0.0  ;;  %v2559_v10 = vld [vmem:[%s2631_s3] ss:$0 sm:$0xff]  ;;  %v1093_v43 = vpop.f32.mrf.mxu3 }
 0x181   : > { %v1010_v25 = vpop.f32.mrf.mxu1  ;;  %v914_v30 = vpop.f32.mrf.mxu2 }
 0x182   : > { %v1260_v29 = vmax.f32 %v1196_v24, 0.0  ;;  %v1355_v32 = vpack.c.bf16 %v1291_v27, %v1291_v27  ;;  %v1084_v33 = vadd.f32 %v1083_v13, %v914_v30 }
 0x183   : > { %v836_v34 = vpop.f32.mrf.mxu0 }
 0x184   : > { %v1324_v36 = vpack.c.bf16 %v1260_v29, %v1260_v29  ;;  %v1006_v37 = vadd.f32 %v1005_v55, %v836_v34  ;;  %1420 = vst.msk [vmem:[%s2240_s12 + $0xe4] sm:$0xf] %vm1362_vm3, %v1355_v32  ;;  %v1160_v38 = vmul.f32 %v2542_v5, %v1084_v33 }
 0x186   : > { %1389 = vst.msk [vmem:[%s2240_s12 + $0x68] sm:$0xf] %vm1362_vm3, %v1324_v36  ;;  %v1129_v39 = vmul.f32 %v2542_v5, %v1006_v37  ;;  %v1228_v12 = vadd.f32 %v2559_v10, %v1160_v38 }
 0x188   : > { %v1197_v1 = vadd.f32 %v2559_v10, %v1129_v39  ;;  %v1292_v41 = vmax.f32 %v1228_v12, 0.0 }
 0x189   : > { %v1013_v40 = vpop.f32.mrf.mxu1  ;;  %v916_v62 = vpop.f32.mrf.mxu2 }
 0x18a   : > { %v1261_v61 = vmax.f32 %v1197_v1, 0.0  ;;  %v1356_v45 = vpack.c.bf16 %v1292_v41, %v1292_v41  ;;  %v1086_v47 = vadd.f32 %v1085_v31, %v916_v62 }
 0x18b   : > { %v839_v46 = vpop.f32.mrf.mxu0 }
 0x18c   : > { %v1325_v48 = vpack.c.bf16 %v1261_v61, %v1261_v61  ;;  %v1009_v50 = vadd.f32 %v1008_v11, %v839_v46  ;;  %1421 = vst.msk [vmem:[%s2240_s12 + $0xe8] sm:$0xf] %vm1362_vm3, %v1356_v45  ;;  %v1161_v51 = vmul.f32 %v2542_v5, %v1086_v47  ;;  %v1095_v45 = vpop.f32.mrf.mxu3 }
 0x18e   : > { %1390 = vst.msk [vmem:[%s2240_s12 + $0x6c] sm:$0xf] %vm1362_vm3, %v1325_v48  ;;  %v1130_v52 = vmul.f32 %v2542_v5, %v1009_v50  ;;  %v1229_v54 = vadd.f32 %v2559_v10, %v1161_v51 }
 0x190   : > { %v1198_v56 = vadd.f32 %v2559_v10, %v1130_v52  ;;  %v1293_v58 = vmax.f32 %v1229_v54, 0.0 }
 0x191   : > { %v1015_v57 = vpop.f32.mrf.mxu1  ;;  %v919_v59 = vpop.f32.mrf.mxu2 }
 0x192   : > { %v1262_v26 = vmax.f32 %v1198_v56, 0.0  ;;  %v1357_v60 = vpack.c.bf16 %v1293_v58, %v1293_v58  ;;  %v1089_v55 = vadd.f32 %v1088_v49, %v919_v59 }
 0x193   : > { %v841_v28 = vpop.f32.mrf.mxu0 }
 0x194   : > { %v1326_v22 = vpack.c.bf16 %v1262_v26, %v1262_v26  ;;  %v1011_v20 = vadd.f32 %v1010_v25, %v841_v28  ;;  %1422 = vst.msk [vmem:[%s2240_s12 + $0xec] sm:$0xf] %vm1362_vm3, %v1357_v60  ;;  %v1162_v63 = vmul.f32 %v2542_v5, %v1089_v55 }
 0x196   : > { %1391 = vst.msk [vmem:[%s2240_s12 + $0x70] sm:$0xf] %vm1362_vm3, %v1326_v22  ;;  %v1131_v3 = vmul.f32 %v2542_v5, %v1011_v20  ;;  %v1230_v4 = vadd.f32 %v2559_v10, %v1162_v63 }
 0x198   : > { %v1199_v6 = vadd.f32 %v2559_v10, %v1131_v3  ;;  %v1294_v8 = vmax.f32 %v1230_v4, 0.0 }
 0x199   : > { %v1018_v7 = vpop.f32.mrf.mxu1  ;;  %v921_v11 = vpop.f32.mrf.mxu2 }
 0x19a   : > { %v1019_v53 = vadd.f32 %v1018_v7, %v2235_v16  ;;  %v1263_v9 = vmax.f32 %v1199_v6, 0.0  ;;  %v1358_v13 = vpack.c.bf16 %v1294_v8, %v1294_v8  ;;  %v1091_v17 = vadd.f32 %v1090_v2, %v921_v11 }
 0x19b   : > { %v844_v18 = vpop.f32.mrf.mxu0 }
 0x19c   : > { %v1134_v14 = vmul.f32 %v2542_v5, %v1019_v53  ;;  %v1327_v19 = vpack.c.bf16 %v1263_v9, %v1263_v9  ;;  %v1014_v44 = vadd.f32 %v1013_v40, %v844_v18  ;;  %1423 = vst.msk [vmem:[%s2240_s12 + $0xf0] sm:$0xf] %vm1362_vm3, %v1358_v13  ;;  %v1163_v42 = vmul.f32 %v2542_v5, %v1091_v17 }
 0x19e   : > { %v1202_v0 = vadd.f32 %v2559_v10, %v1134_v14  ;;  %1392 = vst.msk [vmem:[%s2240_s12 + $0x74] sm:$0xf] %vm1362_vm3, %v1327_v19  ;;  %v1132_v16 = vmul.f32 %v2542_v5, %v1014_v44  ;;  %v1231_v23 = vadd.f32 %v2559_v10, %v1163_v42 }
 0x1a0   : > { %v1266_v21 = vmax.f32 %v1202_v0, 0.0  ;;  %v1200_v15 = vadd.f32 %v2559_v10, %v1132_v16  ;;  %v1295_v27 = vmax.f32 %v1231_v23, 0.0 }
 0x1a1   : > { %v1020_v24 = vpop.f32.mrf.mxu1  ;;  %v924_v31 = vpop.f32.mrf.mxu2 }
 0x1a2   : > { %v1330_v25 = vpack.c.bf16 %v1266_v21, %v1266_v21  ;;  %v1021_v29 = vadd.f32 %v1020_v24, %v2256_v35  ;;  %v1264_v30 = vmax.f32 %v1200_v15, 0.0  ;;  %v1359_v32 = vpack.c.bf16 %v1295_v27, %v1295_v27 }
 0x1a3   : > { %v1094_v34 = vadd.f32 %v1093_v43, %v924_v31  ;;  %v846_v36 = vpop.f32.mrf.mxu0 }
 0x1a4   : > { %1395 = vst.msk [vmem:[%s2240_s12 + $0x80] sm:$0xf] %vm1362_vm3, %v1330_v25  ;;  %v1135_v33 = vmul.f32 %v2542_v5, %v1021_v29  ;;  %v1328_v37 = vpack.c.bf16 %v1264_v30, %v1264_v30  ;;  %v1016_v38 = vadd.f32 %v1015_v57, %v846_v36 }
 0x1a5   : > { %1424 = vst.msk [vmem:[%s2240_s12 + $0xf4] sm:$0xf] %vm1362_vm3, %v1359_v32  ;;  %v1164_v12 = vmul.f32 %v2542_v5, %v1094_v34 }
 0x1a6   : > { %v1203_v39 = vadd.f32 %v2559_v10, %v1135_v33  ;;  %1393 = vst.msk [vmem:[%s2240_s12 + $0x78] sm:$0xf] %vm1362_vm3, %v1328_v37  ;;  %v1133_v35 = vmul.f32 %v2542_v5, %v1016_v38 }
 0x1a7   : > { %v1232_v40 = vadd.f32 %v2559_v10, %v1164_v12 }
 0x1a8   : > { %v1267_v1 = vmax.f32 %v1203_v39, 0.0  ;;  %v1201_v41 = vadd.f32 %v2559_v10, %v1133_v35 }
 0x1a9   : > { %v1296_v62 = vmax.f32 %v1232_v40, 0.0  ;;  %v926_v46 = vpop.f32.mrf.mxu2 }
 0x1aa   : > { %v1331_v61 = vpack.c.bf16 %v1267_v1, %v1267_v1  ;;  %v1265_v47 = vmax.f32 %v1201_v41, 0.0  ;;  %v1096_v49 = vadd.f32 %v1095_v45, %v926_v46 }
 0x1ab   : > { %v1360_v48 = vpack.c.bf16 %v1296_v62, %v1296_v62 }
 0x1ac   : > { %1396 = vst.msk [vmem:[%s2240_s12 + $0x84] sm:$0xf] %vm1362_vm3, %v1331_v61  ;;  %v1329_v50 = vpack.c.bf16 %v1265_v47, %v1265_v47  ;;  %v1165_v51 = vmul.f32 %v2542_v5, %v1096_v49 }
 0x1ad   : > { %1425 = vst.msk [vmem:[%s2240_s12 + $0xf8] sm:$0xf] %vm1362_vm3, %v1360_v48 }
 0x1ae   : > { %1394 = vst.msk [vmem:[%s2240_s12 + $0x7c] sm:$0xf] %vm1362_vm3, %v1329_v50  ;;  %v1233_v52 = vadd.f32 %v2559_v10, %v1165_v51 }
 0x1b0   : > { %v1297_v54 = vmax.f32 %v1233_v52, 0.0 }
 0x1b2   : > { %v1361_v56 = vpack.c.bf16 %v1297_v54, %v1297_v54 }
 0x1b4   : > { %1426 = vst.msk [vmem:[%s2240_s12 + $0xfc] sm:$0xf] %vm1362_vm3, %v1361_v56 }
 0x1b5 PF: > { %s14_s19 = sadd.s32 1, %s2020_s19   ;;  %s2633_s15 = smov %s2012_s17 }
 0x1b6   : > { %p11_p7 = scmp.ge.s32.totalorder %s14_s19, 6   ;;  %s2634_s16 = smov %s2016_s18 }
 0x1b7   : > { %s2635_s17 = smov %s2638_s20  ;;  %s2636_s18 = smov %s2642_s21 }
 0x1b8   :  { %13 = sbr.rel (!%p11_p7) target bundleno = 3 (0x3), region = 67 }

</bundles_post_ra>
